<compile_context>
chip_gen: v6e
topology: v6e:2x2x1
jax: 0.10.0
libtpu: 0.0.40
codegen_flags: <defaults>
</compile_context>

<pallas_src>
import jax
import jax.numpy as jnp
from jax.experimental import pallas as pl
from jax.experimental.pallas import tpu as pltpu  # noqa: F401  (TPU backend; kept for clarity)

# ----------------------------- sizes (small, deterministic) -----------------------------
IN_DIM = 768        # fixed by the module: Linear(768, rnn_dim)
RNN_DIM = 512       # args.rnn_dim
OUT_PAD = 128       # value head padded 1 -> 128 for a lane-dense output store
B = 2               # batch


# ----------------------------- fused MLP kernel -----------------------------
def critic_kernel(x_ref, w1_ref, b1_ref, w2_ref, b2_ref, out_ref):
    x = x_ref[...]                                                        # (B, 768)
    # Linear(768, rnn_dim) + ReLU
    h = jnp.dot(x, w1_ref[...], preferred_element_type=jnp.float32) + b1_ref[...]
    h = jnp.maximum(h, 0.0)                                               # (B, 512)
    # Dropout: identity at inference.
    # Linear(rnn_dim, 1), padded to 128 output lanes (zeros beyond column 0)
    v = jnp.dot(h, w2_ref[...], preferred_element_type=jnp.float32) + b2_ref[...]
    out_ref[...] = v                                                      # (B, 128) lane-dense


def critic_forward(params, state):
    """state: (B, 768) f32 -> value: (B,) f32  (matches .squeeze() for B > 1)."""
    out = pl.pallas_call(
        critic_kernel,
        out_shape=jax.ShapeDtypeStruct((state.shape[0], OUT_PAD), jnp.float32),
    )(state, params["w1_t"], params["b1"], params["w2_t_pad"], params["b2_pad"])
    return out[:, 0]                    # slice the single valid output column


# ----------------------------- parameters (deterministic) -----------------------------
def init_params(key):
    ks = jax.random.split(key, 4)
    scale = 0.05
    # PyTorch layout: Linear(in, out) stores weight as (out, in)
    w1 = jax.random.normal(ks[0], (RNN_DIM, IN_DIM), jnp.float32) * scale   # (512, 768)
    b1 = jax.random.normal(ks[1], (RNN_DIM,), jnp.float32) * scale          # (512,)
    w2 = jax.random.normal(ks[2], (1, RNN_DIM), jnp.float32) * scale        # (1, 512)
    b2 = jax.random.normal(ks[3], (1,), jnp.float32) * scale                # (1,)

    # Pre-transpose for x @ W, and pad the 1-wide value head to 128 lanes.
    w2_t_pad = jnp.zeros((RNN_DIM, OUT_PAD), jnp.float32).at[:, 0].set(w2[0])
    b2_pad = jnp.zeros((1, OUT_PAD), jnp.float32).at[0, 0].set(b2[0])

    return {
        "w1_t": w1.T,                           # (768, 512)
        "b1": b1.reshape(1, RNN_DIM),           # (1, 512)
        "w2_t_pad": w2_t_pad,                   # (512, 128)
        "b2_pad": b2_pad,                       # (1, 128)
        # keep raw params for the pure-JAX reference
        "_w1": w1, "_b1": b1, "_w2": w2, "_b2": b2,
    }


# ----------------------------- pure-JAX reference -----------------------------
def reference_forward(params, state):
    h = jnp.maximum(state @ params["_w1"].T + params["_b1"], 0.0)
    v = h @ params["_w2"].T + params["_b2"]                               # (B, 1)
    return jnp.squeeze(v)                                                 # (B,)


# ----------------------------- main -----------------------------
if __name__ == "__main__":
    key = jax.random.PRNGKey(0)
    kp, kx = jax.random.split(key, 2)

    params = init_params(kp)
    state = jax.random.normal(kx, (B, IN_DIM), jnp.float32)

    value = critic_forward(params, state)
    jax.block_until_ready(value)

    ref_value = reference_forward(params, state)
    assert value.shape == (B,)
    assert jnp.allclose(value, ref_value, atol=1e-4, rtol=1e-4)

    print("KERNEL_OK")
</pallas_src>

<mosaic_0001>
module attributes {stable_mosaic.version = 11 : i64} {
  func.func @critic_kernel(%arg0: memref<2x768xf32, #tpu.memory_space<vmem>>, %arg1: memref<768x512xf32, #tpu.memory_space<vmem>>, %arg2: memref<1x512xf32, #tpu.memory_space<vmem>>, %arg3: memref<512x128xf32, #tpu.memory_space<vmem>>, %arg4: memref<1x128xf32, #tpu.memory_space<vmem>>, %arg5: memref<2x128xf32, #tpu.memory_space<vmem>>) attributes {dimension_semantics = [], scalar_prefetch = 0 : i64, scratch_operands = 0 : i64, tpu.core_type = #tpu.core_type<tc>} {
    %c0 = arith.constant 0 : index
    %c0_0 = arith.constant 0 : index
    %0 = vector.load %arg0[%c0, %c0_0] : memref<2x768xf32, #tpu.memory_space<vmem>>, vector<2x768xf32>
    %c0_1 = arith.constant 0 : index
    %c0_2 = arith.constant 0 : index
    %1 = vector.load %arg1[%c0_1, %c0_2] : memref<768x512xf32, #tpu.memory_space<vmem>>, vector<768x512xf32>
    %cst = arith.constant dense<0.000000e+00> : vector<2x512xf32>
    %2 = tpu.matmul %0, %1, %cst {dimension_numbers = #tpu.dot_dimension_numbers<[1], [0], [0], [1], [0, 0, 1, 1], [], []>} : vector<2x768xf32>, vector<768x512xf32>, vector<2x512xf32> -> vector<2x512xf32>
    %c0_3 = arith.constant 0 : index
    %c0_4 = arith.constant 0 : index
    %3 = vector.load %arg2[%c0_3, %c0_4] : memref<1x512xf32, #tpu.memory_space<vmem>>, vector<1x512xf32>
    %4 = vector.broadcast %3 : vector<1x512xf32> to vector<2x512xf32>
    %5 = arith.addf %2, %4 : vector<2x512xf32>
    %cst_5 = arith.constant 0.000000e+00 : f32
    %6 = vector.broadcast %cst_5 : f32 to vector<2x512xf32>
    %7 = arith.maximumf %5, %6 : vector<2x512xf32>
    %c0_6 = arith.constant 0 : index
    %c0_7 = arith.constant 0 : index
    %8 = vector.load %arg3[%c0_6, %c0_7] : memref<512x128xf32, #tpu.memory_space<vmem>>, vector<512x128xf32>
    %cst_8 = arith.constant dense<0.000000e+00> : vector<2x128xf32>
    %9 = tpu.matmul %7, %8, %cst_8 {dimension_numbers = #tpu.dot_dimension_numbers<[1], [0], [0], [1], [0, 0, 1, 1], [], []>} : vector<2x512xf32>, vector<512x128xf32>, vector<2x128xf32> -> vector<2x128xf32>
    %c0_9 = arith.constant 0 : index
    %c0_10 = arith.constant 0 : index
    %10 = vector.load %arg4[%c0_9, %c0_10] : memref<1x128xf32, #tpu.memory_space<vmem>>, vector<1x128xf32>
    %11 = vector.broadcast %10 : vector<1x128xf32> to vector<2x128xf32>
    %12 = arith.addf %9, %11 : vector<2x128xf32>
    %c0_11 = arith.constant 0 : index
    %c0_12 = arith.constant 0 : index
    %13 = vector.load %arg5[%c0_11, %c0_12] : memref<2x128xf32, #tpu.memory_space<vmem>>, vector<2x128xf32>
    tpu.vector_store %arg5[%c0_11, %c0_12], %12 {strides = array<i32>} : memref<2x128xf32, #tpu.memory_space<vmem>>, vector<2x128xf32>,
    return
  }
}

</mosaic_0001>

<bundles_post_ra>
// kernel: tpu_custom_call.1
= control target key start
LH: loop header
LB: loop body
LE: loop exit
PB: predicated region body
PF: predicated region fallthrough
CT: control target
= control target key end

     0   :  { %10 = vsyncpa [#allocation3], 0  ;;  %s1491_s0 = inlined_call_operand.hbm [shape: f32[2,768], index: 0, kind: input, shape index: {}]   ;;  %s1492_s1 = inlined_call_operand.hbm [shape: f32[768,512], index: 1, kind: input, shape index: {}]   ;;  %s1493_s2 = inlined_call_operand.hbm [shape: f32[1,512], index: 2, kind: input, shape index: {}]   ;;  %s1494_s3 = inlined_call_operand.hbm [shape: f32[512,128], index: 3, kind: input, shape index: {}]   ;;  %s1495_s4 = inlined_call_operand.hbm [shape: f32[1,128], index: 4, kind: input, shape index: {}]   ;;  %s1496_s5 = inlined_call_operand.hbm [shape: f32[2,128], index: 5, kind: output, shape index: {}]  }
   0x1   :  { %11 = vsyncpa [#allocation6], 0 }
   0x2   :  { %12 = vsyncpa [#allocation9], 0 }
   0x3   :  { %13 = vsyncpa [#allocation4], 0  ;;  %s1395_s18 = smov [#allocation5]  }
   0x4   :  { %s29_s19 = sshll.u32 %s1395_s18, 4  ;;  %s30_s19 = int_to_ptr.vmem [resolvable:$true] %s29_s19 }
   0x5   :  { %s1275_s20 = scalar_lea.vmem %s30_s19, 49152  ;;  %p1280_p1 = scmp.lt.s32.totalorder %s30_s19, %s30_s19 }
   0x6   :  { %p1276_p0 = scmp.ne.s32.totalorder %s30_s19, %s1275_s20  ;;  %p1281_p2 = scmp.lt.s32.totalorder %s1275_s20, %s1275_s20 }
   0x8   :  { %p1282_p3 = por %p1281_p2, %p1280_p1 }
   0xa   :  { %p1283_p4 = pnand %p1282_p3, %p1276_p0 }
   0xc   :  { %1286 = shalt.err (!%p1283_p4)
}
   0xd   :  { %s1396_s21 = smov 512   ;;  %s1397_s22 = smov 32  }
   0xe   :  { %35 = dma.hbm_to_vmem [thread:$0]  %s1492_s1, 49152, %s30_s19, [#allocation6], %s1396_s21, %s1396_s21, %s1397_s22  }
   0xf   :  { %s1398_s25 = smov [#allocation8]  }
  0x10   :  { %s51_s26 = sshll.u32 %s1398_s25, 4  ;;  %s52_s26 = int_to_ptr.vmem [resolvable:$true] %s51_s26 }
  0x11   :  { %s1295_s27 = scalar_lea.vmem %s52_s26, 8192  ;;  %p1300_p6 = scmp.lt.s32.totalorder %s52_s26, %s52_s26 }
  0x12   :  { %p1296_p5 = scmp.ne.s32.totalorder %s52_s26, %s1295_s27  ;;  %p1301_p7 = scmp.lt.s32.totalorder %s1295_s27, %s1295_s27 }
  0x14   :  { %p1302_p8 = por %p1301_p7, %p1300_p6 }
  0x16   :  { %p1303_p9 = pnand %p1302_p8, %p1296_p5 }
  0x18   :  { %1306 = shalt.err (!%p1303_p9)
}
  0x19   :  { %s1399_s28 = smov 128   ;;  %s1400_s29 = smov 8  }
  0x1a   :  { %57 = dma.hbm_to_vmem [thread:$0]  %s1494_s3, 8192, %s52_s26, [#allocation9], %s1399_s28, %s1399_s28, %s1400_s29  }
  0x1b   :  { %s1401_s7 = smov [#allocation2]   ;;  %s1402_s9 = smov [#allocation7]  }
  0x1c   :  { %s20_s8 = sshll.u32 %s1401_s7, 4  ;;  %s42_s1 = sshll.u32 %s1402_s9, 4  ;;  %s21_s8 = int_to_ptr.vmem [resolvable:$true] %s20_s8  ;;  %s43_s1 = int_to_ptr.vmem [resolvable:$true] %s42_s1 }
  0x1d   :  { %s1315_s10 = scalar_lea.vmem %s21_s8, 192  ;;  %p1320_p11 = scmp.lt.s32.totalorder %s21_s8, %s21_s8 }
  0x1e   :  { %p1316_p10 = scmp.ne.s32.totalorder %s21_s8, %s1315_s10  ;;  %p1321_p12 = scmp.lt.s32.totalorder %s1315_s10, %s1315_s10 }
  0x20   :  { %p1322_p13 = por %p1321_p12, %p1320_p11 }
  0x22   :  { %p1323_p0 = pnand %p1322_p13, %p1316_p10 }
  0x24   :  { %1326 = shalt.err (!%p1323_p0)
}
  0x25   :  { %23 = dma.hbm_to_vmem [thread:$0]  %s1491_s0, 192, %s21_s8, [#allocation3]  }
  0x26   :  { %s1335_s13 = scalar_lea.vmem %s43_s1, 64  ;;  %p1340_p2 = scmp.lt.s32.totalorder %s43_s1, %s43_s1 }
  0x27   :  { %p1336_p1 = scmp.ne.s32.totalorder %s43_s1, %s1335_s13  ;;  %p1341_p3 = scmp.lt.s32.totalorder %s1335_s13, %s1335_s13 }
  0x29   :  { %p1342_p4 = por %p1341_p3, %p1340_p2 }
  0x2b   :  { %p1343_p5 = pnand %p1342_p4, %p1336_p1 }
  0x2d   :  { %1346 = shalt.err (!%p1343_p5)
}
  0x2e   :  { %45 = dma.hbm_to_vmem [thread:$0]  %s1493_s2, 64, %s43_s1, [#allocation6]  }
  0x2f   :  { %s1403_s15 = smov [#allocation10]  }
  0x30   :  { %s64_s16 = sshll.u32 %s1403_s15, 4  ;;  %s65_s16 = int_to_ptr.vmem [resolvable:$true] %s64_s16 }
  0x31   :  { %s1355_s17 = scalar_lea.vmem %s65_s16, 16  ;;  %s1359_s18 = scalar_lea.vmem %s65_s16, 32 }
  0x32   :  { %p1356_p6 = scmp.ne.s32.totalorder %s65_s16, %s1355_s17  ;;  %p1360_p7 = scmp.lt.s32.totalorder %s65_s16, %s65_s16 }
  0x33   :  { %p1361_p8 = scmp.lt.s32.totalorder %s1359_s18, %s1355_s17 }
  0x35   :  { %p1362_p9 = por %p1361_p8, %p1360_p7 }
  0x37   :  { %p1363_p10 = pnand %p1362_p9, %p1356_p6 }
  0x39   :  { %1366 = shalt.err (!%p1363_p10)
}
  0x3a   :  { %67 = dma.hbm_to_vmem [thread:$0]  %s1495_s4, 16, %s65_s16, [#allocation9]  }
  0x3b   :  { %1387 = dma.done.wait [#allocation3], 192  }
  0x3c   :  { %1388 = vsyncadd [#allocation3], 4294967104 }
  0x3d   :  { %1389 = dma.done.wait [#allocation6], 49216  }
  0x3e   :  { %1390 = vsyncadd [#allocation6], 4294918080 }
  0x3f   :  { %1391 = dma.done.wait [#allocation9], 8208  }
  0x40   :  { %1392 = vsyncadd [#allocation9], 4294959088  ;;  %v146_v0 = vld [vmem:[#allocation5 + $0x1e8] sm:$0xff]  ;;  %v145_v2 = vld [vmem:[#allocation5 + $0x1e0] sm:$0xff]  ;;  %s1405_s2 = smov [#allocation11]  }
  0x41   :  { %v274_v1 = vld [vmem:[#allocation5 + $0x5e8] sm:$0xff]  ;;  %524 = vmatprep.subr.mxu0 %v146_v0  ;;  %v273_v3 = vld [vmem:[#allocation5 + $0x5e0] sm:$0xff]  ;;  %s1172_s4 = sshll.u32 %s1405_s2, 4  ;;  %s1173_s4 = int_to_ptr.vmem [resolvable:$true] %s1172_s4 }
  0x42   :  { %595 = vmatprep.subr.mxu1 %v274_v1  ;;  %v142_v4 = vld [vmem:[#allocation5 + $0x1c8] sm:$0xff]  ;;  %525 = vmatpush1.msra.mxu0 %v145_v2  ;;  %v141_v6 = vld [vmem:[#allocation5 + $0x1c0] sm:$0xff]  ;;  %s1367_s20 = scalar_lea.vmem %s1173_s4, 32  ;;  %p1372_p12 = scmp.lt.s32.totalorder %s1173_s4, %s1173_s4 }
  0x43   :  { %v270_v5 = vld [vmem:[#allocation5 + $0x5c8] sm:$0xff]  ;;  %596 = vmatpush1.msra.mxu1 %v273_v3  ;;  %v269_v7 = vld [vmem:[#allocation5 + $0x5c0] sm:$0xff]  ;;  %526 = vmatprep.subr.mxu0 %v142_v4  ;;  %p1368_p11 = scmp.ne.s32.totalorder %s1173_s4, %s1367_s20  ;;  %p1373_p13 = scmp.lt.s32.totalorder %s1367_s20, %s1367_s20 }
  0x44   :  { %v138_v8 = vld [vmem:[#allocation5 + $0x1a8] sm:$0xff]  ;;  %597 = vmatprep.subr.mxu1 %v270_v5  ;;  %v137_v10 = vld [vmem:[#allocation5 + $0x1a0] sm:$0xff]  ;;  %527 = vmatpush1.msra.mxu0 %v141_v6 }
  0x45   :  { %v266_v9 = vld [vmem:[#allocation5 + $0x5a8] sm:$0xff]  ;;  %v265_v11 = vld [vmem:[#allocation5 + $0x5a0] sm:$0xff]  ;;  %598 = vmatpush1.msra.mxu1 %v269_v7  ;;  %528 = vmatprep.subr.mxu0 %v138_v8  ;;  %p1374_p0 = por %p1373_p13, %p1372_p12 }
  0x46   :  { %v134_v12 = vld [vmem:[#allocation5 + $0x188] sm:$0xff]  ;;  %599 = vmatprep.subr.mxu1 %v266_v9  ;;  %v133_v14 = vld [vmem:[#allocation5 + $0x180] sm:$0xff]  ;;  %529 = vmatpush1.msra.mxu0 %v137_v10 }
  0x47   :  { %v262_v13 = vld [vmem:[#allocation5 + $0x588] sm:$0xff]  ;;  %v261_v15 = vld [vmem:[#allocation5 + $0x580] sm:$0xff]  ;;  %600 = vmatpush1.msra.mxu1 %v265_v11  ;;  %530 = vmatprep.subr.mxu0 %v134_v12  ;;  %p1375_p1 = pnand %p1374_p0, %p1368_p11 }
  0x48   :  { %v130_v16 = vld [vmem:[#allocation5 + $0x168] sm:$0xff]  ;;  %601 = vmatprep.subr.mxu1 %v262_v13  ;;  %v129_v18 = vld [vmem:[#allocation5 + $0x160] sm:$0xff]  ;;  %531 = vmatpush1.msra.mxu0 %v133_v14 }
  0x49   :  { %v258_v17 = vld [vmem:[#allocation5 + $0x568] sm:$0xff]  ;;  %v257_v19 = vld [vmem:[#allocation5 + $0x560] sm:$0xff]  ;;  %602 = vmatpush1.msra.mxu1 %v261_v15  ;;  %532 = vmatprep.subr.mxu0 %v130_v16 }
  0x4a   :  { %v126_v20 = vld [vmem:[#allocation5 + $0x148] sm:$0xff]  ;;  %603 = vmatprep.subr.mxu1 %v258_v17  ;;  %v125_v22 = vld [vmem:[#allocation5 + $0x140] sm:$0xff]  ;;  %533 = vmatpush1.msra.mxu0 %v129_v18 }
  0x4b   :  { %v254_v21 = vld [vmem:[#allocation5 + $0x548] sm:$0xff]  ;;  %v253_v23 = vld [vmem:[#allocation5 + $0x540] sm:$0xff]  ;;  %604 = vmatpush1.msra.mxu1 %v257_v19  ;;  %534 = vmatprep.subr.mxu0 %v126_v20 }
  0x4c   :  { %v122_v24 = vld [vmem:[#allocation5 + $0x128] sm:$0xff]  ;;  %605 = vmatprep.subr.mxu1 %v254_v21  ;;  %v121_v26 = vld [vmem:[#allocation5 + $0x120] sm:$0xff]  ;;  %535 = vmatpush1.msra.mxu0 %v125_v22 }
  0x4d   :  { %v250_v25 = vld [vmem:[#allocation5 + $0x528] sm:$0xff]  ;;  %v249_v27 = vld [vmem:[#allocation5 + $0x520] sm:$0xff]  ;;  %606 = vmatpush1.msra.mxu1 %v253_v23  ;;  %536 = vmatprep.subr.mxu0 %v122_v24 }
  0x4e   :  { %v118_v28 = vld [vmem:[#allocation5 + $0x108] sm:$0xff]  ;;  %607 = vmatprep.subr.mxu1 %v250_v25  ;;  %v117_v30 = vld [vmem:[#allocation5 + $0x100] sm:$0xff]  ;;  %537 = vmatpush1.msra.mxu0 %v121_v26 }
  0x4f   :  { %v246_v29 = vld [vmem:[#allocation5 + $0x508] sm:$0xff]  ;;  %v245_v31 = vld [vmem:[#allocation5 + $0x500] sm:$0xff]  ;;  %608 = vmatpush1.msra.mxu1 %v249_v27  ;;  %538 = vmatprep.subr.mxu0 %v118_v28 }
  0x50   :  { %v114_v32 = vld [vmem:[#allocation5 + $0xe8] sm:$0xff]  ;;  %609 = vmatprep.subr.mxu1 %v246_v29  ;;  %v113_v34 = vld [vmem:[#allocation5 + $0xe0] sm:$0xff]  ;;  %539 = vmatpush1.msra.mxu0 %v117_v30  ;;  %v471_v30 = vlaneseq }
  0x51   :  { %v242_v33 = vld [vmem:[#allocation5 + $0x4e8] sm:$0xff]  ;;  %v241_v35 = vld [vmem:[#allocation5 + $0x4e0] sm:$0xff]  ;;  %610 = vmatpush1.msra.mxu1 %v245_v31  ;;  %540 = vmatprep.subr.mxu0 %v114_v32  ;;  %v1404_v31 = vmov 1983009808  }
  0x52   :  { %v110_v36 = vld [vmem:[#allocation5 + $0xc8] sm:$0xff]  ;;  %611 = vmatprep.subr.mxu1 %v242_v33  ;;  %v109_v38 = vld [vmem:[#allocation5 + $0xc0] sm:$0xff]  ;;  %541 = vmatpush1.msra.mxu0 %v113_v34  ;;  %v495_v32 = vunpack.c.l.s4 %v1404_v31  ;;  %v131_v31 = vld [vmem:[#allocation5 + $0x170] sm:$0xff] }
  0x53   :  { %v238_v37 = vld [vmem:[#allocation5 + $0x4c8] sm:$0xff]  ;;  %v237_v39 = vld [vmem:[#allocation5 + $0x4c0] sm:$0xff]  ;;  %612 = vmatpush1.msra.mxu1 %v241_v35  ;;  %542 = vmatprep.subr.mxu0 %v110_v36 }
  0x54   :  { %v106_v40 = vld [vmem:[#allocation5 + $0xa8] sm:$0xff]  ;;  %613 = vmatprep.subr.mxu1 %v238_v37  ;;  %v105_v42 = vld [vmem:[#allocation5 + $0xa0] sm:$0xff]  ;;  %543 = vmatpush1.msra.mxu0 %v109_v38 }
  0x55   :  { %v234_v41 = vld [vmem:[#allocation5 + $0x4a8] sm:$0xff]  ;;  %v233_v43 = vld [vmem:[#allocation5 + $0x4a0] sm:$0xff]  ;;  %614 = vmatpush1.msra.mxu1 %v237_v39  ;;  %544 = vmatprep.subr.mxu0 %v106_v40 }
  0x56   :  { %v102_v44 = vld [vmem:[#allocation5 + $0x88] sm:$0xff]  ;;  %615 = vmatprep.subr.mxu1 %v234_v41  ;;  %v101_v46 = vld [vmem:[#allocation5 + $0x80] sm:$0xff]  ;;  %545 = vmatpush1.msra.mxu0 %v105_v42  ;;  %v1451_v41 = vshrl.u32 %v471_v30, 7  ;;  %v496_v42 = vunpack.c.0.s8 %v495_v32 }
  0x57   :  { %v230_v45 = vld [vmem:[#allocation5 + $0x488] sm:$0xff]  ;;  %v229_v47 = vld [vmem:[#allocation5 + $0x480] sm:$0xff]  ;;  %616 = vmatpush1.msra.mxu1 %v233_v43  ;;  %546 = vmatprep.subr.mxu0 %v102_v44 }
  0x58   :  { %v98_v48 = vld [vmem:[#allocation5 + $0x68] sm:$0xff]  ;;  %617 = vmatprep.subr.mxu1 %v230_v45  ;;  %v97_v50 = vld [vmem:[#allocation5 + $0x60] sm:$0xff]  ;;  %547 = vmatpush1.msra.mxu0 %v101_v46 }
  0x59   :  { %v226_v49 = vld [vmem:[#allocation5 + $0x468] sm:$0xff]  ;;  %v225_v51 = vld [vmem:[#allocation5 + $0x460] sm:$0xff]  ;;  %618 = vmatpush1.msra.mxu1 %v229_v47  ;;  %548 = vmatprep.subr.mxu0 %v98_v48 }
  0x5a   :  { %v94_v52 = vld [vmem:[#allocation5 + $0x48] sm:$0xff]  ;;  %619 = vmatprep.subr.mxu1 %v226_v49  ;;  %v93_v54 = vld [vmem:[#allocation5 + $0x40] sm:$0xff]  ;;  %549 = vmatpush1.msra.mxu0 %v97_v50  ;;  %v83_v49 = vld [vmem:[#allocation2] sm:$0xff] }
  0x5b   :  { %v222_v53 = vld [vmem:[#allocation5 + $0x448] sm:$0xff]  ;;  %v221_v55 = vld [vmem:[#allocation5 + $0x440] sm:$0xff]  ;;  %620 = vmatpush1.msra.mxu1 %v225_v51  ;;  %550 = vmatprep.subr.mxu0 %v94_v52  ;;  %v499_v52 = vsub.s32 %v496_v42, %v1451_v41  ;;  %v120_v42 = vld [vmem:[#allocation5 + $0x118] sm:$0xff] }
  0x5c   :  { %v90_v56 = vld [vmem:[#allocation5 + $0x28] sm:$0xff]  ;;  %621 = vmatprep.subr.mxu1 %v222_v53  ;;  %v89_v58 = vld [vmem:[#allocation5 + $0x20] sm:$0xff]  ;;  %551 = vmatpush1.msra.mxu0 %v93_v54 }
  0x5d   :  { %v218_v57 = vld [vmem:[#allocation5 + $0x428] sm:$0xff]  ;;  %v217_v59 = vld [vmem:[#allocation5 + $0x420] sm:$0xff]  ;;  %622 = vmatpush1.msra.mxu1 %v221_v55  ;;  %552 = vmatprep.subr.mxu0 %v90_v56 }
  0x5e   :  { %v86_v60 = vld [vmem:[#allocation5 + $0x8] sm:$0xff]  ;;  %623 = vmatprep.subr.mxu1 %v218_v57  ;;  %v85_v62 = vld [vmem:[#allocation5] sm:$0xff]  ;;  %553 = vmatpush1.msra.mxu0 %v89_v58  ;;  %v493_v57 = vcombine.high %v83_v49, %v83_v49 }
  0x5f   :  { %v214_v61 = vld [vmem:[#allocation5 + $0x408] sm:$0xff]  ;;  %v213_v63 = vld [vmem:[#allocation5 + $0x400] sm:$0xff]  ;;  %624 = vmatpush1.msra.mxu1 %v217_v59  ;;  %554 = vmatprep.subr.mxu0 %v86_v60 }
  0x60   :  { %v210_v0 = vld [vmem:[#allocation5 + $0x3e8] sm:$0xff]  ;;  %625 = vmatprep.subr.mxu1 %v214_v61  ;;  %v209_v2 = vld [vmem:[#allocation5 + $0x3e0] sm:$0xff]  ;;  %555 = vmatpush1.msra.mxu0 %v85_v62  ;;  %v1454_v62 = vrot.slane %v83_v49, %v499_v52 }
  0x61   :  { %v338_v1 = vld [vmem:[#allocation5 + $0x7e8] sm:$0xff]  ;;  %v337_v3 = vld [vmem:[#allocation5 + $0x7e0] sm:$0xff]  ;;  %626 = vmatpush1.msra.mxu1 %v213_v63  ;;  %556 = vmatprep.subr.mxu0 %v210_v0 }
  0x62   :  { %v206_v4 = vld [vmem:[#allocation5 + $0x3c8] sm:$0xff]  ;;  %627 = vmatprep.subr.mxu1 %v338_v1  ;;  %v205_v6 = vld [vmem:[#allocation5 + $0x3c0] sm:$0xff]  ;;  %557 = vmatpush2.msra.mxu0 %v209_v2 }
  0x63   :  { %v334_v5 = vld [vmem:[#allocation5 + $0x7c8] sm:$0xff]  ;;  %v333_v7 = vld [vmem:[#allocation5 + $0x7c0] sm:$0xff]  ;;  %628 = vmatpush2.msra.mxu1 %v337_v3  ;;  %558 = vmatprep.subr.mxu0 %v206_v4  ;;  %v1456_v3 = vrot.slane %v493_v57, %v499_v52  ;;  %v111_v52 = vld [vmem:[#allocation5 + $0xd0] sm:$0xff] }
  0x64   :  { %v202_v8 = vld [vmem:[#allocation5 + $0x3a8] sm:$0xff]  ;;  %629 = vmatprep.subr.mxu1 %v334_v5  ;;  %v201_v10 = vld [vmem:[#allocation5 + $0x3a0] sm:$0xff]  ;;  %559 = vmatpush2.msra.mxu0 %v205_v6 }
  0x65   :  { %v330_v9 = vld [vmem:[#allocation5 + $0x7a8] sm:$0xff]  ;;  %v329_v11 = vld [vmem:[#allocation5 + $0x7a0] sm:$0xff]  ;;  %630 = vmatpush2.msra.mxu1 %v333_v7  ;;  %560 = vmatprep.subr.mxu0 %v202_v8  ;;  %v1460_v8 = vcombine.high %v1454_v62, %v1454_v62 }
  0x66   :  { %v198_v12 = vld [vmem:[#allocation5 + $0x388] sm:$0xff]  ;;  %631 = vmatprep.subr.mxu1 %v330_v9  ;;  %v197_v14 = vld [vmem:[#allocation5 + $0x380] sm:$0xff]  ;;  %561 = vmatpush2.msra.mxu0 %v201_v10 }
  0x67   :  { %v326_v13 = vld [vmem:[#allocation5 + $0x788] sm:$0xff]  ;;  %v325_v15 = vld [vmem:[#allocation5 + $0x780] sm:$0xff]  ;;  %632 = vmatpush2.msra.mxu1 %v329_v11  ;;  %562 = vmatprep.subr.mxu0 %v198_v12  ;;  %v1464_v11 = vcombine.high %v1456_v3, %v1456_v3 }
  0x68   :  { %v194_v16 = vld [vmem:[#allocation5 + $0x368] sm:$0xff]  ;;  %633 = vmatprep.subr.mxu1 %v326_v13  ;;  %v193_v18 = vld [vmem:[#allocation5 + $0x360] sm:$0xff]  ;;  %563 = vmatpush2.msra.mxu0 %v197_v14  ;;  %v148_v13 = vld [vmem:[#allocation5 + $0x1f8] sm:$0xff] }
  0x69   :  { %v322_v17 = vld [vmem:[#allocation5 + $0x768] sm:$0xff]  ;;  %v321_v19 = vld [vmem:[#allocation5 + $0x760] sm:$0xff]  ;;  %634 = vmatpush2.msra.mxu1 %v325_v15  ;;  %564 = vmatprep.subr.mxu0 %v194_v16  ;;  %v147_v15 = vld [vmem:[#allocation5 + $0x1f0] sm:$0xff] }
  0x6a   :  { %v190_v20 = vld [vmem:[#allocation5 + $0x348] sm:$0xff]  ;;  %635 = vmatprep.subr.mxu1 %v322_v17  ;;  %v189_v22 = vld [vmem:[#allocation5 + $0x340] sm:$0xff]  ;;  %565 = vmatpush2.msra.mxu0 %v193_v18  ;;  %v144_v17 = vld [vmem:[#allocation5 + $0x1d8] sm:$0xff] }
  0x6b   :  { %v318_v21 = vld [vmem:[#allocation5 + $0x748] sm:$0xff]  ;;  %v317_v23 = vld [vmem:[#allocation5 + $0x740] sm:$0xff]  ;;  %636 = vmatpush2.msra.mxu1 %v321_v19  ;;  %566 = vmatprep.subr.mxu0 %v190_v20  ;;  %v143_v19 = vld [vmem:[#allocation5 + $0x1d0] sm:$0xff] }
  0x6c   :  { %v186_v24 = vld [vmem:[#allocation5 + $0x328] sm:$0xff]  ;;  %637 = vmatprep.subr.mxu1 %v318_v21  ;;  %v185_v26 = vld [vmem:[#allocation5 + $0x320] sm:$0xff]  ;;  %567 = vmatpush2.msra.mxu0 %v189_v22  ;;  %v140_v21 = vld [vmem:[#allocation5 + $0x1b8] sm:$0xff] }
  0x6d   :  { %v314_v25 = vld [vmem:[#allocation5 + $0x728] sm:$0xff]  ;;  %v313_v27 = vld [vmem:[#allocation5 + $0x720] sm:$0xff]  ;;  %638 = vmatpush2.msra.mxu1 %v317_v23  ;;  %568 = vmatprep.subr.mxu0 %v186_v24  ;;  %v139_v23 = vld [vmem:[#allocation5 + $0x1b0] sm:$0xff] }
  0x6e   :  { %v182_v28 = vld [vmem:[#allocation5 + $0x308] sm:$0xff]  ;;  %639 = vmatprep.subr.mxu1 %v314_v25  ;;  %v181_v33 = vld [vmem:[#allocation5 + $0x300] sm:$0xff]  ;;  %569 = vmatpush2.msra.mxu0 %v185_v26  ;;  %v136_v25 = vld [vmem:[#allocation5 + $0x198] sm:$0xff] }
  0x6f   :  { %v310_v29 = vld [vmem:[#allocation5 + $0x708] sm:$0xff]  ;;  %v309_v34 = vld [vmem:[#allocation5 + $0x700] sm:$0xff]  ;;  %640 = vmatpush2.msra.mxu1 %v313_v27  ;;  %570 = vmatprep.subr.mxu0 %v182_v28  ;;  %v135_v27 = vld [vmem:[#allocation5 + $0x190] sm:$0xff] }
  0x70   :  { %v178_v35 = vld [vmem:[#allocation5 + $0x2e8] sm:$0xff]  ;;  %641 = vmatprep.subr.mxu1 %v310_v29  ;;  %v177_v37 = vld [vmem:[#allocation5 + $0x2e0] sm:$0xff]  ;;  %571 = vmatpush2.msra.mxu0 %v181_v33  ;;  %v132_v29 = vld [vmem:[#allocation5 + $0x178] sm:$0xff] }
  0x71   :  { %v306_v36 = vld [vmem:[#allocation5 + $0x6e8] sm:$0xff]  ;;  %v305_v38 = vld [vmem:[#allocation5 + $0x6e0] sm:$0xff]  ;;  %642 = vmatpush2.msra.mxu1 %v309_v34  ;;  %572 = vmatprep.subr.mxu0 %v178_v35  ;;  %v128_v33 = vld [vmem:[#allocation5 + $0x158] sm:$0xff] }
  0x72   :  { %v174_v39 = vld [vmem:[#allocation5 + $0x2c8] sm:$0xff]  ;;  %643 = vmatprep.subr.mxu1 %v306_v36  ;;  %v173_v43 = vld [vmem:[#allocation5 + $0x2c0] sm:$0xff]  ;;  %573 = vmatpush2.msra.mxu0 %v177_v37  ;;  %v127_v35 = vld [vmem:[#allocation5 + $0x150] sm:$0xff] }
  0x73   :  { %v302_v40 = vld [vmem:[#allocation5 + $0x6c8] sm:$0xff]  ;;  %v301_v44 = vld [vmem:[#allocation5 + $0x6c0] sm:$0xff]  ;;  %644 = vmatpush2.msra.mxu1 %v305_v38  ;;  %574 = vmatprep.subr.mxu0 %v174_v39  ;;  %v124_v37 = vld [vmem:[#allocation5 + $0x138] sm:$0xff] }
  0x74   :  { %v170_v45 = vld [vmem:[#allocation5 + $0x2a8] sm:$0xff]  ;;  %645 = vmatprep.subr.mxu1 %v302_v40  ;;  %v169_v47 = vld [vmem:[#allocation5 + $0x2a0] sm:$0xff]  ;;  %575 = vmatpush2.msra.mxu0 %v173_v43  ;;  %v123_v39 = vld [vmem:[#allocation5 + $0x130] sm:$0xff] }
  0x75   :  { %v298_v46 = vld [vmem:[#allocation5 + $0x6a8] sm:$0xff]  ;;  %v297_v48 = vld [vmem:[#allocation5 + $0x6a0] sm:$0xff]  ;;  %646 = vmatpush2.msra.mxu1 %v301_v44  ;;  %576 = vmatprep.subr.mxu0 %v170_v45  ;;  %v119_v44 = vld [vmem:[#allocation5 + $0x110] sm:$0xff] }
  0x76   :  { %v166_v50 = vld [vmem:[#allocation5 + $0x288] sm:$0xff]  ;;  %647 = vmatprep.subr.mxu1 %v298_v46  ;;  %v165_v53 = vld [vmem:[#allocation5 + $0x280] sm:$0xff]  ;;  %577 = vmatpush2.msra.mxu0 %v169_v47  ;;  %v116_v46 = vld [vmem:[#allocation5 + $0xf8] sm:$0xff] }
  0x77   :  { %v294_v51 = vld [vmem:[#allocation5 + $0x688] sm:$0xff]  ;;  %v293_v54 = vld [vmem:[#allocation5 + $0x680] sm:$0xff]  ;;  %648 = vmatpush2.msra.mxu1 %v297_v48  ;;  %578 = vmatprep.subr.mxu0 %v166_v50  ;;  %v115_v48 = vld [vmem:[#allocation5 + $0xf0] sm:$0xff] }
  0x78   :  { %v162_v55 = vld [vmem:[#allocation5 + $0x268] sm:$0xff]  ;;  %649 = vmatprep.subr.mxu1 %v294_v51  ;;  %v161_v58 = vld [vmem:[#allocation5 + $0x260] sm:$0xff]  ;;  %579 = vmatpush2.msra.mxu0 %v165_v53  ;;  %v112_v50 = vld [vmem:[#allocation5 + $0xd8] sm:$0xff] }
  0x79   :  { %v290_v56 = vld [vmem:[#allocation5 + $0x668] sm:$0xff]  ;;  %v289_v59 = vld [vmem:[#allocation5 + $0x660] sm:$0xff]  ;;  %650 = vmatpush2.msra.mxu1 %v293_v54  ;;  %580 = vmatprep.subr.mxu0 %v162_v55  ;;  %v108_v54 = vld [vmem:[#allocation5 + $0xb8] sm:$0xff] }
  0x7a   :  { %v158_v60 = vld [vmem:[#allocation5 + $0x248] sm:$0xff]  ;;  %651 = vmatprep.subr.mxu1 %v290_v56  ;;  %v157_v63 = vld [vmem:[#allocation5 + $0x240] sm:$0xff]  ;;  %581 = vmatpush2.msra.mxu0 %v161_v58  ;;  %v107_v56 = vld [vmem:[#allocation5 + $0xb0] sm:$0xff] }
  0x7b   :  { %v286_v61 = vld [vmem:[#allocation5 + $0x648] sm:$0xff]  ;;  %v285_v0 = vld [vmem:[#allocation5 + $0x640] sm:$0xff]  ;;  %652 = vmatpush2.msra.mxu1 %v289_v59  ;;  %582 = vmatprep.subr.mxu0 %v158_v60  ;;  %v104_v58 = vld [vmem:[#allocation5 + $0x98] sm:$0xff] }
  0x7c   :  { %v154_v1 = vld [vmem:[#allocation5 + $0x228] sm:$0xff]  ;;  %653 = vmatprep.subr.mxu1 %v286_v61  ;;  %v153_v4 = vld [vmem:[#allocation5 + $0x220] sm:$0xff]  ;;  %583 = vmatpush2.msra.mxu0 %v157_v63  ;;  %v103_v60 = vld [vmem:[#allocation5 + $0x90] sm:$0xff] }
  0x7d   :  { %v282_v2 = vld [vmem:[#allocation5 + $0x628] sm:$0xff]  ;;  %v281_v5 = vld [vmem:[#allocation5 + $0x620] sm:$0xff]  ;;  %654 = vmatpush2.msra.mxu1 %v285_v0  ;;  %584 = vmatprep.subr.mxu0 %v154_v1  ;;  %v100_v63 = vld [vmem:[#allocation5 + $0x78] sm:$0xff] }
  0x7e   :  { %v150_v6 = vld [vmem:[#allocation5 + $0x208] sm:$0xff]  ;;  %655 = vmatprep.subr.mxu1 %v282_v2  ;;  %v149_v9 = vld [vmem:[#allocation5 + $0x200] sm:$0xff]  ;;  %585 = vmatpush2.msra.mxu0 %v153_v4  ;;  %v99_v1 = vld [vmem:[#allocation5 + $0x70] sm:$0xff] }
  0x7f   :  { %v278_v7 = vld [vmem:[#allocation5 + $0x608] sm:$0xff]  ;;  %656 = vmatpush2.msra.mxu1 %v281_v5  ;;  %v277_v10 = vld [vmem:[#allocation5 + $0x600] sm:$0xff]  ;;  %586 = vmatprep.subr.mxu0 %v150_v6  ;;  %v96_v4 = vld [vmem:[#allocation5 + $0x58] sm:$0xff] }
  0x80   :  { %657 = vmatprep.subr.mxu1 %v278_v7  ;;  %v402_v12 = vld [vmem:[#allocation5 + $0x9e8] sm:$0xff]  ;;  %587 = vmatpush2.msra.mxu0 %v149_v9  ;;  %v401_v14 = vld [vmem:[#allocation5 + $0x9e0] sm:$0xff]  ;;  %v95_v6 = vld [vmem:[#allocation5 + $0x50] sm:$0xff] }
  0x81   :  { %588 = vmatprep.mubr.f32.mxu0 %v1460_v8  ;;  %658 = vmatpush2.msra.mxu1 %v277_v10  ;;  %v398_v16 = vld [vmem:[#allocation5 + $0x9c8] sm:$0xff]  ;;  %v397_v18 = vld [vmem:[#allocation5 + $0x9c0] sm:$0xff]  ;;  %v92_v9 = vld [vmem:[#allocation5 + $0x38] sm:$0xff] }
  0x82   :  { %589 = vmatmul.mubr.f32.vlgmr.msra.gmra.mxu0 %v1454_v62  ;;  %659 = vmatprep.mubr.f32.mxu1 %v1464_v11  ;;  %v394_v20 = vld [vmem:[#allocation5 + $0x9a8] sm:$0xff]  ;;  %v393_v22 = vld [vmem:[#allocation5 + $0x9a0] sm:$0xff] }
  0x83   :  { %666 = vmatprep.subr.mxu0 %v402_v12  ;;  %737 = vmatprep.subr.mxu1 %v148_v13  ;;  %v390_v24 = vld [vmem:[#allocation5 + $0x988] sm:$0xff]  ;;  %v389_v26 = vld [vmem:[#allocation5 + $0x980] sm:$0xff]  ;;  %v91_v12 = vld [vmem:[#allocation5 + $0x30] sm:$0xff] }
  0x84   :  { %660 = vmatmul.mubr.f32.vlgmr.msra.gmra.mxu1 %v1456_v3  ;;  %667 = vmatpush1.msra.mxu0 %v401_v14  ;;  %v386_v28 = vld [vmem:[#allocation5 + $0x968] sm:$0xff]  ;;  %v385_v30 = vld [vmem:[#allocation5 + $0x960] sm:$0xff]  ;;  %v88_v14 = vld [vmem:[#allocation5 + $0x18] sm:$0xff] }
  0x85   :  { %738 = vmatpush1.msra.mxu1 %v147_v15  ;;  %668 = vmatprep.subr.mxu0 %v398_v16  ;;  %v382_v32 = vld [vmem:[#allocation5 + $0x948] sm:$0xff]  ;;  %v381_v34 = vld [vmem:[#allocation5 + $0x940] sm:$0xff]  ;;  %v87_v16 = vld [vmem:[#allocation5 + $0x10] sm:$0xff] }
  0x86   :  { %739 = vmatprep.subr.mxu1 %v144_v17  ;;  %669 = vmatpush1.msra.mxu0 %v397_v18  ;;  %v378_v36 = vld [vmem:[#allocation5 + $0x928] sm:$0xff]  ;;  %v377_v38 = vld [vmem:[#allocation5 + $0x920] sm:$0xff]  ;;  %v212_v18 = vld [vmem:[#allocation5 + $0x3f8] sm:$0xff] }
  0x87   :  { %740 = vmatpush1.msra.mxu1 %v143_v19  ;;  %670 = vmatprep.subr.mxu0 %v394_v20  ;;  %v374_v40 = vld [vmem:[#allocation5 + $0x908] sm:$0xff]  ;;  %v373_v43 = vld [vmem:[#allocation5 + $0x900] sm:$0xff]  ;;  %v211_v20 = vld [vmem:[#allocation5 + $0x3f0] sm:$0xff] }
  0x88   :  { %741 = vmatprep.subr.mxu1 %v140_v21  ;;  %671 = vmatpush1.msra.mxu0 %v393_v22  ;;  %v370_v45 = vld [vmem:[#allocation5 + $0x8e8] sm:$0xff]  ;;  %v369_v47 = vld [vmem:[#allocation5 + $0x8e0] sm:$0xff]  ;;  %v208_v22 = vld [vmem:[#allocation5 + $0x3d8] sm:$0xff] }
  0x89   :  { %742 = vmatpush1.msra.mxu1 %v139_v23  ;;  %672 = vmatprep.subr.mxu0 %v390_v24  ;;  %v366_v49 = vld [vmem:[#allocation5 + $0x8c8] sm:$0xff]  ;;  %v365_v51 = vld [vmem:[#allocation5 + $0x8c0] sm:$0xff]  ;;  %v207_v24 = vld [vmem:[#allocation5 + $0x3d0] sm:$0xff] }
  0x8a   :  { %743 = vmatprep.subr.mxu1 %v136_v25  ;;  %673 = vmatpush1.msra.mxu0 %v389_v26  ;;  %v362_v53 = vld [vmem:[#allocation5 + $0x8a8] sm:$0xff]  ;;  %v361_v55 = vld [vmem:[#allocation5 + $0x8a0] sm:$0xff]  ;;  %v204_v26 = vld [vmem:[#allocation5 + $0x3b8] sm:$0xff] }
  0x8b   :  { %744 = vmatpush1.msra.mxu1 %v135_v27  ;;  %674 = vmatprep.subr.mxu0 %v386_v28  ;;  %v358_v57 = vld [vmem:[#allocation5 + $0x888] sm:$0xff]  ;;  %v357_v59 = vld [vmem:[#allocation5 + $0x880] sm:$0xff]  ;;  %v203_v28 = vld [vmem:[#allocation5 + $0x3b0] sm:$0xff] }
  0x8c   :  { %745 = vmatprep.subr.mxu1 %v132_v29  ;;  %675 = vmatpush1.msra.mxu0 %v385_v30  ;;  %v354_v61 = vld [vmem:[#allocation5 + $0x868] sm:$0xff]  ;;  %v353_v0 = vld [vmem:[#allocation5 + $0x860] sm:$0xff]  ;;  %v200_v30 = vld [vmem:[#allocation5 + $0x398] sm:$0xff] }
  0x8d   :  { %746 = vmatpush1.msra.mxu1 %v131_v31  ;;  %676 = vmatprep.subr.mxu0 %v382_v32  ;;  %v350_v2 = vld [vmem:[#allocation5 + $0x848] sm:$0xff]  ;;  %v349_v5 = vld [vmem:[#allocation5 + $0x840] sm:$0xff]  ;;  %v199_v32 = vld [vmem:[#allocation5 + $0x390] sm:$0xff] }
  0x8e   :  { %747 = vmatprep.subr.mxu1 %v128_v33  ;;  %677 = vmatpush1.msra.mxu0 %v381_v34  ;;  %v346_v7 = vld [vmem:[#allocation5 + $0x828] sm:$0xff]  ;;  %v345_v10 = vld [vmem:[#allocation5 + $0x820] sm:$0xff]  ;;  %v196_v34 = vld [vmem:[#allocation5 + $0x378] sm:$0xff] }
  0x8f   :  { %748 = vmatpush1.msra.mxu1 %v127_v35  ;;  %678 = vmatprep.subr.mxu0 %v378_v36  ;;  %v342_v13 = vld [vmem:[#allocation5 + $0x808] sm:$0xff]  ;;  %v341_v15 = vld [vmem:[#allocation5 + $0x800] sm:$0xff]  ;;  %v195_v36 = vld [vmem:[#allocation5 + $0x370] sm:$0xff] }
  0x90   :  { %749 = vmatprep.subr.mxu1 %v124_v37  ;;  %679 = vmatpush1.msra.mxu0 %v377_v38  ;;  %v466_v17 = vld [vmem:[#allocation5 + $0xbe8] sm:$0xff]  ;;  %v465_v19 = vld [vmem:[#allocation5 + $0xbe0] sm:$0xff]  ;;  %v192_v38 = vld [vmem:[#allocation5 + $0x358] sm:$0xff] }
  0x91   :  { %750 = vmatpush1.msra.mxu1 %v123_v39  ;;  %680 = vmatprep.subr.mxu0 %v374_v40  ;;  %v462_v21 = vld [vmem:[#allocation5 + $0xbc8] sm:$0xff]  ;;  %v461_v23 = vld [vmem:[#allocation5 + $0xbc0] sm:$0xff]  ;;  %v191_v40 = vld [vmem:[#allocation5 + $0x350] sm:$0xff] }
  0x92   :  { %751 = vmatprep.subr.mxu1 %v120_v42  ;;  %681 = vmatpush1.msra.mxu0 %v373_v43  ;;  %v458_v25 = vld [vmem:[#allocation5 + $0xba8] sm:$0xff]  ;;  %v457_v27 = vld [vmem:[#allocation5 + $0xba0] sm:$0xff]  ;;  %v188_v43 = vld [vmem:[#allocation5 + $0x338] sm:$0xff] }
  0x93   :  { %752 = vmatpush1.msra.mxu1 %v119_v44  ;;  %682 = vmatprep.subr.mxu0 %v370_v45  ;;  %v454_v29 = vld [vmem:[#allocation5 + $0xb88] sm:$0xff]  ;;  %v453_v31 = vld [vmem:[#allocation5 + $0xb80] sm:$0xff]  ;;  %v187_v45 = vld [vmem:[#allocation5 + $0x330] sm:$0xff] }
  0x94   :  { %753 = vmatprep.subr.mxu1 %v116_v46  ;;  %683 = vmatpush1.msra.mxu0 %v369_v47  ;;  %v450_v33 = vld [vmem:[#allocation5 + $0xb68] sm:$0xff]  ;;  %v449_v35 = vld [vmem:[#allocation5 + $0xb60] sm:$0xff]  ;;  %v184_v47 = vld [vmem:[#allocation5 + $0x318] sm:$0xff] }
  0x95   :  { %754 = vmatpush1.msra.mxu1 %v115_v48  ;;  %684 = vmatprep.subr.mxu0 %v366_v49  ;;  %v446_v37 = vld [vmem:[#allocation5 + $0xb48] sm:$0xff]  ;;  %v445_v39 = vld [vmem:[#allocation5 + $0xb40] sm:$0xff]  ;;  %v183_v49 = vld [vmem:[#allocation5 + $0x310] sm:$0xff] }
  0x96   :  { %755 = vmatprep.subr.mxu1 %v112_v50  ;;  %685 = vmatpush1.msra.mxu0 %v365_v51  ;;  %v442_v42 = vld [vmem:[#allocation5 + $0xb28] sm:$0xff]  ;;  %v441_v44 = vld [vmem:[#allocation5 + $0xb20] sm:$0xff]  ;;  %v180_v51 = vld [vmem:[#allocation5 + $0x2f8] sm:$0xff] }
  0x97   :  { %756 = vmatpush1.msra.mxu1 %v111_v52  ;;  %686 = vmatprep.subr.mxu0 %v362_v53  ;;  %v438_v46 = vld [vmem:[#allocation5 + $0xb08] sm:$0xff]  ;;  %v437_v48 = vld [vmem:[#allocation5 + $0xb00] sm:$0xff]  ;;  %v179_v53 = vld [vmem:[#allocation5 + $0x2f0] sm:$0xff] }
  0x98   :  { %757 = vmatprep.subr.mxu1 %v108_v54  ;;  %687 = vmatpush1.msra.mxu0 %v361_v55  ;;  %v434_v50 = vld [vmem:[#allocation5 + $0xae8] sm:$0xff]  ;;  %v433_v52 = vld [vmem:[#allocation5 + $0xae0] sm:$0xff]  ;;  %v176_v55 = vld [vmem:[#allocation5 + $0x2d8] sm:$0xff] }
  0x99   :  { %758 = vmatpush1.msra.mxu1 %v107_v56  ;;  %688 = vmatprep.subr.mxu0 %v358_v57  ;;  %v430_v54 = vld [vmem:[#allocation5 + $0xac8] sm:$0xff]  ;;  %v429_v56 = vld [vmem:[#allocation5 + $0xac0] sm:$0xff]  ;;  %v175_v57 = vld [vmem:[#allocation5 + $0x2d0] sm:$0xff] }
  0x9a   :  { %759 = vmatprep.subr.mxu1 %v104_v58  ;;  %689 = vmatpush1.msra.mxu0 %v357_v59  ;;  %v426_v58 = vld [vmem:[#allocation5 + $0xaa8] sm:$0xff]  ;;  %v172_v59 = vld [vmem:[#allocation5 + $0x2b8] sm:$0xff] }
  0x9b   :  { %760 = vmatpush1.msra.mxu1 %v103_v60  ;;  %690 = vmatprep.subr.mxu0 %v354_v61  ;;  %v425_v60 = vld [vmem:[#allocation5 + $0xaa0] sm:$0xff]  ;;  %v171_v61 = vld [vmem:[#allocation5 + $0x2b0] sm:$0xff] }
  0x9c   :  { %761 = vmatprep.subr.mxu1 %v100_v63  ;;  %691 = vmatpush1.msra.mxu0 %v353_v0  ;;  %v422_v63 = vld [vmem:[#allocation5 + $0xa88] sm:$0xff]  ;;  %v168_v0 = vld [vmem:[#allocation5 + $0x298] sm:$0xff] }
  0x9d   :  { %762 = vmatpush1.msra.mxu1 %v99_v1  ;;  %692 = vmatprep.subr.mxu0 %v350_v2  ;;  %v421_v1 = vld [vmem:[#allocation5 + $0xa80] sm:$0xff]  ;;  %v167_v2 = vld [vmem:[#allocation5 + $0x290] sm:$0xff] }
  0x9e   :  { %763 = vmatprep.subr.mxu1 %v96_v4  ;;  %693 = vmatpush1.msra.mxu0 %v349_v5  ;;  %v418_v4 = vld [vmem:[#allocation5 + $0xa68] sm:$0xff]  ;;  %v164_v5 = vld [vmem:[#allocation5 + $0x278] sm:$0xff] }
  0x9f   :  { %764 = vmatpush1.msra.mxu1 %v95_v6  ;;  %694 = vmatprep.subr.mxu0 %v346_v7  ;;  %v417_v6 = vld [vmem:[#allocation5 + $0xa60] sm:$0xff]  ;;  %v163_v7 = vld [vmem:[#allocation5 + $0x270] sm:$0xff] }
  0xa0   :  { %765 = vmatprep.subr.mxu1 %v92_v9  ;;  %695 = vmatpush1.msra.mxu0 %v345_v10  ;;  %v414_v9 = vld [vmem:[#allocation5 + $0xa48] sm:$0xff]  ;;  %v160_v10 = vld [vmem:[#allocation5 + $0x258] sm:$0xff] }
  0xa1   :  { %766 = vmatpush1.msra.mxu1 %v91_v12  ;;  %696 = vmatprep.subr.mxu0 %v342_v13  ;;  %v413_v12 = vld [vmem:[#allocation5 + $0xa40] sm:$0xff]  ;;  %v159_v13 = vld [vmem:[#allocation5 + $0x250] sm:$0xff] }
  0xa2   :  { %767 = vmatprep.subr.mxu1 %v88_v14  ;;  %697 = vmatpush1.msra.mxu0 %v341_v15  ;;  %v1470_v14 = vld.sshfl [vmem:[#allocation2 + $0x8] sm:$0x33 pattern:$0x76325410]  ;;  %v410_v15 = vld [vmem:[#allocation5 + $0xa28] sm:$0xff] }
  0xa3   :  { %768 = vmatpush1.msra.mxu1 %v87_v16  ;;  %698 = vmatprep.subr.mxu0 %v466_v17  ;;  %v156_v16 = vld [vmem:[#allocation5 + $0x238] sm:$0xff]  ;;  %v409_v17 = vld [vmem:[#allocation5 + $0xa20] sm:$0xff] }
  0xa4   :  { %769 = vmatprep.subr.mxu1 %v212_v18  ;;  %699 = vmatpush2.msra.mxu0 %v465_v19  ;;  %v155_v18 = vld [vmem:[#allocation5 + $0x230] sm:$0xff]  ;;  %v406_v19 = vld [vmem:[#allocation5 + $0xa08] sm:$0xff] }
  0xa5   :  { %770 = vmatpush2.msra.mxu1 %v211_v20  ;;  %700 = vmatprep.subr.mxu0 %v462_v21  ;;  %v152_v20 = vld [vmem:[#allocation5 + $0x218] sm:$0xff]  ;;  %v1474_v21 = vcombine.high %v1470_v14, %v1470_v14 }
  0xa6   :  { %771 = vmatprep.subr.mxu1 %v208_v22  ;;  %701 = vmatpush2.msra.mxu0 %v461_v23  ;;  %v405_v22 = vld [vmem:[#allocation5 + $0xa00] sm:$0xff]  ;;  %v151_v23 = vld [vmem:[#allocation5 + $0x210] sm:$0xff] }
  0xa7   :  { %772 = vmatpush2.msra.mxu1 %v207_v24  ;;  %702 = vmatprep.subr.mxu0 %v458_v25  ;;  %v276_v24 = vld [vmem:[#allocation5 + $0x5f8] sm:$0xff] }
  0xa8   :  { %773 = vmatprep.subr.mxu1 %v204_v26  ;;  %703 = vmatpush2.msra.mxu0 %v457_v27  ;;  %v404_v25 = vld [vmem:[#allocation5 + $0x9f8] sm:$0xff]  ;;  %v275_v26 = vld [vmem:[#allocation5 + $0x5f0] sm:$0xff] }
  0xa9   :  { %774 = vmatpush2.msra.mxu1 %v203_v28  ;;  %704 = vmatprep.subr.mxu0 %v454_v29  ;;  %v403_v27 = vld [vmem:[#allocation5 + $0x9f0] sm:$0xff]  ;;  %v272_v28 = vld [vmem:[#allocation5 + $0x5d8] sm:$0xff] }
  0xaa   :  { %775 = vmatprep.subr.mxu1 %v200_v30  ;;  %705 = vmatpush2.msra.mxu0 %v453_v31  ;;  %v400_v29 = vld [vmem:[#allocation5 + $0x9d8] sm:$0xff]  ;;  %v271_v30 = vld [vmem:[#allocation5 + $0x5d0] sm:$0xff] }
  0xab   :  { %776 = vmatpush2.msra.mxu1 %v199_v32  ;;  %706 = vmatprep.subr.mxu0 %v450_v33  ;;  %v399_v31 = vld [vmem:[#allocation5 + $0x9d0] sm:$0xff]  ;;  %v268_v32 = vld [vmem:[#allocation5 + $0x5b8] sm:$0xff] }
  0xac   :  { %777 = vmatprep.subr.mxu1 %v196_v34  ;;  %707 = vmatpush2.msra.mxu0 %v449_v35  ;;  %v396_v33 = vld [vmem:[#allocation5 + $0x9b8] sm:$0xff]  ;;  %v267_v34 = vld [vmem:[#allocation5 + $0x5b0] sm:$0xff] }
  0xad   :  { %778 = vmatpush2.msra.mxu1 %v195_v36  ;;  %708 = vmatprep.subr.mxu0 %v446_v37  ;;  %v395_v35 = vld [vmem:[#allocation5 + $0x9b0] sm:$0xff]  ;;  %v264_v36 = vld [vmem:[#allocation5 + $0x598] sm:$0xff] }
  0xae   :  { %779 = vmatprep.subr.mxu1 %v192_v38  ;;  %709 = vmatpush2.msra.mxu0 %v445_v39  ;;  %v263_v37 = vld [vmem:[#allocation5 + $0x590] sm:$0xff]  ;;  %v388_v39 = vld [vmem:[#allocation5 + $0x978] sm:$0xff] }
  0xaf   :  { %780 = vmatpush2.msra.mxu1 %v191_v40  ;;  %710 = vmatprep.subr.mxu0 %v442_v42  ;;  %v391_v38 = vld [vmem:[#allocation5 + $0x990] sm:$0xff] }
  0xb0   :  { %781 = vmatprep.subr.mxu1 %v188_v43  ;;  %711 = vmatpush2.msra.mxu0 %v441_v44  ;;  %v259_v40 = vld [vmem:[#allocation5 + $0x570] sm:$0xff]  ;;  %v256_v43 = vld [vmem:[#allocation5 + $0x558] sm:$0xff] }
  0xb1   :  { %782 = vmatpush2.msra.mxu1 %v187_v45  ;;  %712 = vmatprep.subr.mxu0 %v438_v46  ;;  %v387_v42 = vld [vmem:[#allocation5 + $0x970] sm:$0xff]  ;;  %v384_v44 = vld [vmem:[#allocation5 + $0x958] sm:$0xff] }
  0xb2   :  { %783 = vmatprep.subr.mxu1 %v184_v47  ;;  %713 = vmatpush2.msra.mxu0 %v437_v48  ;;  %v255_v45 = vld [vmem:[#allocation5 + $0x550] sm:$0xff]  ;;  %v252_v47 = vld [vmem:[#allocation5 + $0x538] sm:$0xff] }
  0xb3   :  { %784 = vmatpush2.msra.mxu1 %v183_v49  ;;  %714 = vmatprep.subr.mxu0 %v434_v50  ;;  %v383_v46 = vld [vmem:[#allocation5 + $0x950] sm:$0xff]  ;;  %v380_v48 = vld [vmem:[#allocation5 + $0x938] sm:$0xff] }
  0xb4   :  { %785 = vmatprep.subr.mxu1 %v180_v51  ;;  %715 = vmatpush2.msra.mxu0 %v433_v52  ;;  %v251_v49 = vld [vmem:[#allocation5 + $0x530] sm:$0xff]  ;;  %v248_v51 = vld [vmem:[#allocation5 + $0x518] sm:$0xff] }
  0xb5   :  { %786 = vmatpush2.msra.mxu1 %v179_v53  ;;  %716 = vmatprep.subr.mxu0 %v430_v54  ;;  %v379_v50 = vld [vmem:[#allocation5 + $0x930] sm:$0xff]  ;;  %v376_v52 = vld [vmem:[#allocation5 + $0x918] sm:$0xff] }
  0xb6   :  { %787 = vmatprep.subr.mxu1 %v176_v55  ;;  %717 = vmatpush2.msra.mxu0 %v429_v56  ;;  %v247_v53 = vld [vmem:[#allocation5 + $0x510] sm:$0xff]  ;;  %v244_v55 = vld [vmem:[#allocation5 + $0x4f8] sm:$0xff] }
  0xb7   :  { %788 = vmatpush2.msra.mxu1 %v175_v57  ;;  %718 = vmatprep.subr.mxu0 %v426_v58  ;;  %v375_v54 = vld [vmem:[#allocation5 + $0x910] sm:$0xff]  ;;  %v372_v56 = vld [vmem:[#allocation5 + $0x8f8] sm:$0xff] }
  0xb8   :  { %789 = vmatprep.subr.mxu1 %v172_v59  ;;  %719 = vmatpush2.msra.mxu0 %v425_v60  ;;  %v243_v57 = vld [vmem:[#allocation5 + $0x4f0] sm:$0xff]  ;;  %v240_v59 = vld [vmem:[#allocation5 + $0x4d8] sm:$0xff] }
  0xb9   :  { %790 = vmatpush2.msra.mxu1 %v171_v61  ;;  %720 = vmatprep.subr.mxu0 %v422_v63  ;;  %v371_v58 = vld [vmem:[#allocation5 + $0x8f0] sm:$0xff]  ;;  %v368_v60 = vld [vmem:[#allocation5 + $0x8d8] sm:$0xff] }
  0xba   :  { %791 = vmatprep.subr.mxu1 %v168_v0  ;;  %721 = vmatpush2.msra.mxu0 %v421_v1  ;;  %v239_v61 = vld [vmem:[#allocation5 + $0x4d0] sm:$0xff]  ;;  %v236_v0 = vld [vmem:[#allocation5 + $0x4b8] sm:$0xff] }
  0xbb   :  { %792 = vmatpush2.msra.mxu1 %v167_v2  ;;  %722 = vmatprep.subr.mxu0 %v418_v4  ;;  %v367_v63 = vld [vmem:[#allocation5 + $0x8d0] sm:$0xff]  ;;  %v364_v1 = vld [vmem:[#allocation5 + $0x8b8] sm:$0xff] }
  0xbc   :  { %793 = vmatprep.subr.mxu1 %v164_v5  ;;  %723 = vmatpush2.msra.mxu0 %v417_v6  ;;  %v235_v2 = vld [vmem:[#allocation5 + $0x4b0] sm:$0xff]  ;;  %v232_v5 = vld [vmem:[#allocation5 + $0x498] sm:$0xff] }
  0xbd   :  { %794 = vmatpush2.msra.mxu1 %v163_v7  ;;  %724 = vmatprep.subr.mxu0 %v414_v9  ;;  %v363_v4 = vld [vmem:[#allocation5 + $0x8b0] sm:$0xff]  ;;  %v360_v6 = vld [vmem:[#allocation5 + $0x898] sm:$0xff] }
  0xbe   :  { %795 = vmatprep.subr.mxu1 %v160_v10  ;;  %725 = vmatpush2.msra.mxu0 %v413_v12  ;;  %v231_v7 = vld [vmem:[#allocation5 + $0x490] sm:$0xff]  ;;  %v228_v10 = vld [vmem:[#allocation5 + $0x478] sm:$0xff] }
  0xbf   :  { %796 = vmatpush2.msra.mxu1 %v159_v13  ;;  %726 = vmatprep.subr.mxu0 %v410_v15  ;;  %v359_v9 = vld [vmem:[#allocation5 + $0x890] sm:$0xff]  ;;  %v356_v12 = vld [vmem:[#allocation5 + $0x878] sm:$0xff] }
  0xc0   :  { %797 = vmatprep.subr.mxu1 %v156_v16  ;;  %727 = vmatpush2.msra.mxu0 %v409_v17  ;;  %v227_v13 = vld [vmem:[#allocation5 + $0x470] sm:$0xff]  ;;  %v224_v16 = vld [vmem:[#allocation5 + $0x458] sm:$0xff] }
  0xc1   :  { %798 = vmatpush2.msra.mxu1 %v155_v18  ;;  %728 = vmatprep.subr.mxu0 %v406_v19  ;;  %v355_v15 = vld [vmem:[#allocation5 + $0x870] sm:$0xff]  ;;  %v352_v17 = vld [vmem:[#allocation5 + $0x858] sm:$0xff] }
  0xc2   :  { %799 = vmatprep.subr.mxu1 %v152_v20  ;;  %729 = vmatpush2.msra.mxu0 %v405_v22  ;;  %v223_v18 = vld [vmem:[#allocation5 + $0x450] sm:$0xff]  ;;  %v220_v20 = vld [vmem:[#allocation5 + $0x438] sm:$0xff] }
  0xc3   :  { %730 = vmatprep.mubr.f32.mxu0 %v1474_v21  ;;  %800 = vmatpush2.msra.mxu1 %v151_v23  ;;  %v351_v19 = vld [vmem:[#allocation5 + $0x850] sm:$0xff]  ;;  %v348_v22 = vld [vmem:[#allocation5 + $0x838] sm:$0xff] }
  0xc4   :  { %731 = vmatmul.mubr.f32.vlgmr.msra.gmra.mxu0 %v1470_v14  ;;  %801 = vmatprep.mubr.f32.mxu1 %v1460_v8  ;;  %v392_v8 = vld [vmem:[#allocation5 + $0x998] sm:$0xff]  ;;  %v219_v23 = vld [vmem:[#allocation5 + $0x430] sm:$0xff] }
  0xc5   :  { %808 = vmatprep.subr.mxu0 %v276_v24  ;;  %879 = vmatprep.subr.mxu1 %v404_v25  ;;  %v347_v24 = vld [vmem:[#allocation5 + $0x830] sm:$0xff]  ;;  %v216_v25 = vld [vmem:[#allocation5 + $0x418] sm:$0xff] }
  0xc6   :  { %802 = vmatmul.mubr.f32.vlgmr.msra.gmra.mxu1 %v1454_v62  ;;  %809 = vmatpush1.msra.mxu0 %v275_v26  ;;  %v260_v62 = vld [vmem:[#allocation5 + $0x578] sm:$0xff] }
  0xc7   :  { %880 = vmatpush1.msra.mxu1 %v403_v27  ;;  %810 = vmatprep.subr.mxu0 %v272_v28  ;;  %v344_v26 = vld [vmem:[#allocation5 + $0x818] sm:$0xff]  ;;  %v215_v27 = vld [vmem:[#allocation5 + $0x410] sm:$0xff] }
  0xc8   :  { %881 = vmatprep.subr.mxu1 %v400_v29  ;;  %811 = vmatpush1.msra.mxu0 %v271_v30  ;;  %v343_v28 = vld [vmem:[#allocation5 + $0x810] sm:$0xff]  ;;  %v340_v29 = vld [vmem:[#allocation5 + $0x7f8] sm:$0xff] }
  0xc9   :  { %882 = vmatpush1.msra.mxu1 %v399_v31  ;;  %812 = vmatprep.subr.mxu0 %v268_v32  ;;  %v468_v30 = vld [vmem:[#allocation5 + $0xbf8] sm:$0xff]  ;;  %v339_v31 = vld [vmem:[#allocation5 + $0x7f0] sm:$0xff] }
  0xca   :  { %883 = vmatprep.subr.mxu1 %v396_v33  ;;  %813 = vmatpush1.msra.mxu0 %v267_v34  ;;  %v467_v32 = vld [vmem:[#allocation5 + $0xbf0] sm:$0xff]  ;;  %v336_v33 = vld [vmem:[#allocation5 + $0x7d8] sm:$0xff] }
  0xcb   :  { %884 = vmatpush1.msra.mxu1 %v395_v35  ;;  %814 = vmatprep.subr.mxu0 %v264_v36  ;;  %v464_v34 = vld [vmem:[#allocation5 + $0xbd8] sm:$0xff]  ;;  %v335_v35 = vld [vmem:[#allocation5 + $0x7d0] sm:$0xff] }
  0xcc   :  { %885 = vmatprep.subr.mxu1 %v392_v8  ;;  %815 = vmatpush1.msra.mxu0 %v263_v37  ;;  %v463_v36 = vld [vmem:[#allocation5 + $0xbd0] sm:$0xff]  ;;  %v332_v8 = vld [vmem:[#allocation5 + $0x7b8] sm:$0xff] }
  0xcd   :  { %886 = vmatpush1.msra.mxu1 %v391_v38  ;;  %816 = vmatprep.subr.mxu0 %v260_v62  ;;  %v460_v37 = vld [vmem:[#allocation5 + $0xbb8] sm:$0xff]  ;;  %v331_v38 = vld [vmem:[#allocation5 + $0x7b0] sm:$0xff] }
  0xce   :  { %887 = vmatprep.subr.mxu1 %v388_v39  ;;  %817 = vmatpush1.msra.mxu0 %v259_v40  ;;  %v459_v62 = vld [vmem:[#allocation5 + $0xbb0] sm:$0xff]  ;;  %v328_v39 = vld [vmem:[#allocation5 + $0x798] sm:$0xff] }
  0xcf   :  { %888 = vmatpush1.msra.mxu1 %v387_v42  ;;  %818 = vmatprep.subr.mxu0 %v256_v43  ;;  %v456_v40 = vld [vmem:[#allocation5 + $0xb98] sm:$0xff]  ;;  %v327_v42 = vld [vmem:[#allocation5 + $0x790] sm:$0xff] }
  0xd0   :  { %889 = vmatprep.subr.mxu1 %v384_v44  ;;  %819 = vmatpush1.msra.mxu0 %v255_v45  ;;  %v455_v43 = vld [vmem:[#allocation5 + $0xb90] sm:$0xff]  ;;  %v324_v44 = vld [vmem:[#allocation5 + $0x778] sm:$0xff] }
  0xd1   :  { %890 = vmatpush1.msra.mxu1 %v383_v46  ;;  %820 = vmatprep.subr.mxu0 %v252_v47  ;;  %v452_v45 = vld [vmem:[#allocation5 + $0xb78] sm:$0xff]  ;;  %v323_v46 = vld [vmem:[#allocation5 + $0x770] sm:$0xff] }
  0xd2   :  { %891 = vmatprep.subr.mxu1 %v380_v48  ;;  %821 = vmatpush1.msra.mxu0 %v251_v49  ;;  %v451_v47 = vld [vmem:[#allocation5 + $0xb70] sm:$0xff]  ;;  %v320_v48 = vld [vmem:[#allocation5 + $0x758] sm:$0xff] }
  0xd3   :  { %892 = vmatpush1.msra.mxu1 %v379_v50  ;;  %822 = vmatprep.subr.mxu0 %v248_v51  ;;  %v448_v49 = vld [vmem:[#allocation5 + $0xb58] sm:$0xff]  ;;  %v319_v50 = vld [vmem:[#allocation5 + $0x750] sm:$0xff] }
  0xd4   :  { %893 = vmatprep.subr.mxu1 %v376_v52  ;;  %823 = vmatpush1.msra.mxu0 %v247_v53  ;;  %v447_v51 = vld [vmem:[#allocation5 + $0xb50] sm:$0xff]  ;;  %v316_v52 = vld [vmem:[#allocation5 + $0x738] sm:$0xff] }
  0xd5   :  { %894 = vmatpush1.msra.mxu1 %v375_v54  ;;  %824 = vmatprep.subr.mxu0 %v244_v55  ;;  %v444_v53 = vld [vmem:[#allocation5 + $0xb38] sm:$0xff]  ;;  %v315_v54 = vld [vmem:[#allocation5 + $0x730] sm:$0xff] }
  0xd6   :  { %895 = vmatprep.subr.mxu1 %v372_v56  ;;  %825 = vmatpush1.msra.mxu0 %v243_v57  ;;  %v443_v55 = vld [vmem:[#allocation5 + $0xb30] sm:$0xff]  ;;  %v312_v56 = vld [vmem:[#allocation5 + $0x718] sm:$0xff] }
  0xd7   :  { %896 = vmatpush1.msra.mxu1 %v371_v58  ;;  %826 = vmatprep.subr.mxu0 %v240_v59  ;;  %v440_v57 = vld [vmem:[#allocation5 + $0xb18] sm:$0xff]  ;;  %v311_v58 = vld [vmem:[#allocation5 + $0x710] sm:$0xff] }
  0xd8   :  { %897 = vmatprep.subr.mxu1 %v368_v60  ;;  %827 = vmatpush1.msra.mxu0 %v239_v61  ;;  %v439_v59 = vld [vmem:[#allocation5 + $0xb10] sm:$0xff]  ;;  %v308_v60 = vld [vmem:[#allocation5 + $0x6f8] sm:$0xff] }
  0xd9   :  { %898 = vmatpush1.msra.mxu1 %v367_v63  ;;  %828 = vmatprep.subr.mxu0 %v236_v0  ;;  %v436_v61 = vld [vmem:[#allocation5 + $0xaf8] sm:$0xff]  ;;  %v307_v63 = vld [vmem:[#allocation5 + $0x6f0] sm:$0xff] }
  0xda   :  { %899 = vmatprep.subr.mxu1 %v364_v1  ;;  %829 = vmatpush1.msra.mxu0 %v235_v2  ;;  %v435_v0 = vld [vmem:[#allocation5 + $0xaf0] sm:$0xff]  ;;  %v304_v1 = vld [vmem:[#allocation5 + $0x6d8] sm:$0xff] }
  0xdb   :  { %900 = vmatpush1.msra.mxu1 %v363_v4  ;;  %830 = vmatprep.subr.mxu0 %v232_v5  ;;  %v432_v2 = vld [vmem:[#allocation5 + $0xad8] sm:$0xff]  ;;  %v303_v4 = vld [vmem:[#allocation5 + $0x6d0] sm:$0xff] }
  0xdc   :  { %901 = vmatprep.subr.mxu1 %v360_v6  ;;  %831 = vmatpush1.msra.mxu0 %v231_v7  ;;  %v431_v5 = vld [vmem:[#allocation5 + $0xad0] sm:$0xff]  ;;  %v300_v6 = vld [vmem:[#allocation5 + $0x6b8] sm:$0xff] }
  0xdd   :  { %902 = vmatpush1.msra.mxu1 %v359_v9  ;;  %832 = vmatprep.subr.mxu0 %v228_v10  ;;  %v428_v7 = vld [vmem:[#allocation5 + $0xab8] sm:$0xff]  ;;  %v299_v9 = vld [vmem:[#allocation5 + $0x6b0] sm:$0xff] }
  0xde   :  { %903 = vmatprep.subr.mxu1 %v356_v12  ;;  %833 = vmatpush1.msra.mxu0 %v227_v13  ;;  %v427_v10 = vld [vmem:[#allocation5 + $0xab0] sm:$0xff]  ;;  %v296_v12 = vld [vmem:[#allocation5 + $0x698] sm:$0xff] }
  0xdf   :  { %904 = vmatpush1.msra.mxu1 %v355_v15  ;;  %834 = vmatprep.subr.mxu0 %v224_v16  ;;  %v424_v13 = vld [vmem:[#allocation5 + $0xa98] sm:$0xff]  ;;  %v295_v15 = vld [vmem:[#allocation5 + $0x690] sm:$0xff] }
  0xe0   :  { %905 = vmatprep.subr.mxu1 %v352_v17  ;;  %835 = vmatpush1.msra.mxu0 %v223_v18  ;;  %v423_v16 = vld [vmem:[#allocation5 + $0xa90] sm:$0xff]  ;;  %v292_v17 = vld [vmem:[#allocation5 + $0x678] sm:$0xff] }
  0xe1   :  { %906 = vmatpush1.msra.mxu1 %v351_v19  ;;  %836 = vmatprep.subr.mxu0 %v220_v20  ;;  %v420_v18 = vld [vmem:[#allocation5 + $0xa78] sm:$0xff]  ;;  %v291_v19 = vld [vmem:[#allocation5 + $0x670] sm:$0xff] }
  0xe2   :  { %907 = vmatprep.subr.mxu1 %v348_v22  ;;  %837 = vmatpush1.msra.mxu0 %v219_v23  ;;  %v419_v20 = vld [vmem:[#allocation5 + $0xa70] sm:$0xff]  ;;  %v288_v22 = vld [vmem:[#allocation5 + $0x658] sm:$0xff] }
  0xe3   :  { %908 = vmatpush1.msra.mxu1 %v347_v24  ;;  %838 = vmatprep.subr.mxu0 %v216_v25  ;;  %v416_v23 = vld [vmem:[#allocation5 + $0xa58] sm:$0xff]  ;;  %v287_v24 = vld [vmem:[#allocation5 + $0x650] sm:$0xff] }
  0xe4   :  { %909 = vmatprep.subr.mxu1 %v344_v26  ;;  %839 = vmatpush1.msra.mxu0 %v215_v27  ;;  %v415_v25 = vld [vmem:[#allocation5 + $0xa50] sm:$0xff]  ;;  %v284_v26 = vld [vmem:[#allocation5 + $0x638] sm:$0xff] }
  0xe5   :  { %910 = vmatpush1.msra.mxu1 %v343_v28  ;;  %840 = vmatprep.subr.mxu0 %v340_v29  ;;  %v412_v27 = vld [vmem:[#allocation5 + $0xa38] sm:$0xff]  ;;  %v283_v28 = vld [vmem:[#allocation5 + $0x630] sm:$0xff] }
  0xe6   :  { %911 = vmatprep.subr.mxu1 %v468_v30  ;;  %841 = vmatpush2.msra.mxu0 %v339_v31  ;;  %v411_v29 = vld [vmem:[#allocation5 + $0xa30] sm:$0xff]  ;;  %v280_v30 = vld [vmem:[#allocation5 + $0x618] sm:$0xff] }
  0xe7   :  { %912 = vmatpush2.msra.mxu1 %v467_v32  ;;  %842 = vmatprep.subr.mxu0 %v336_v33  ;;  %v408_v31 = vld [vmem:[#allocation5 + $0xa18] sm:$0xff]  ;;  %v279_v32 = vld [vmem:[#allocation5 + $0x610] sm:$0xff] }
  0xe8   :  { %913 = vmatprep.subr.mxu1 %v464_v34  ;;  %843 = vmatpush2.msra.mxu0 %v335_v35  ;;  %v407_v33 = vld [vmem:[#allocation5 + $0xa10] sm:$0xff]  ;;  %v985_v34 = vld [vmem:[#allocation8 + $0xf8] sm:$0xff] }
  0xe9   :  { %914 = vmatpush2.msra.mxu1 %v463_v36  ;;  %844 = vmatprep.subr.mxu0 %v332_v8  ;;  %v969_v35 = vld [vmem:[#allocation8 + $0x78] sm:$0xff]  ;;  %v984_v36 = vld [vmem:[#allocation8 + $0xf0] sm:$0xff] }
  0xea   :  { %915 = vmatprep.subr.mxu1 %v460_v37  ;;  %845 = vmatpush2.msra.mxu0 %v331_v38  ;;  %v968_v8 = vld [vmem:[#allocation8 + $0x70] sm:$0xff]  ;;  %v983_v37 = vld [vmem:[#allocation8 + $0xe8] sm:$0xff] }
  0xeb   :  { %916 = vmatpush2.msra.mxu1 %v459_v62  ;;  %846 = vmatprep.subr.mxu0 %v328_v39  ;;  %v967_v38 = vld [vmem:[#allocation8 + $0x68] sm:$0xff]  ;;  %v982_v62 = vld [vmem:[#allocation8 + $0xe0] sm:$0xff] }
  0xec   :  { %917 = vmatprep.subr.mxu1 %v456_v40  ;;  %847 = vmatpush2.msra.mxu0 %v327_v42  ;;  %v966_v39 = vld [vmem:[#allocation8 + $0x60] sm:$0xff]  ;;  %v1001_v40 = vld [vmem:[#allocation8 + $0x178] sm:$0xff]  ;;  %v1016_v42 = vld [vmem:[#allocation8 + $0x1f0] sm:$0xff] }
  0xed   :  { %918 = vmatpush2.msra.mxu1 %v455_v43  ;;  %848 = vmatprep.subr.mxu0 %v324_v44  ;;  %v1015_v43 = vld [vmem:[#allocation8 + $0x1e8] sm:$0xff]  ;;  %v980_v44 = vld [vmem:[#allocation8 + $0xd0] sm:$0xff] }
  0xee   :  { %919 = vmatprep.subr.mxu1 %v452_v45  ;;  %849 = vmatpush2.msra.mxu0 %v323_v46  ;;  %v999_v45 = vld [vmem:[#allocation8 + $0x168] sm:$0xff]  ;;  %v964_v46 = vld [vmem:[#allocation8 + $0x50] sm:$0xff] }
  0xef   :  { %920 = vmatpush2.msra.mxu1 %v451_v47  ;;  %850 = vmatprep.subr.mxu0 %v320_v48  ;;  %v1014_v47 = vld [vmem:[#allocation8 + $0x1e0] sm:$0xff]  ;;  %v979_v48 = vld [vmem:[#allocation8 + $0xc8] sm:$0xff] }
  0xf0   :  { %921 = vmatprep.subr.mxu1 %v448_v49  ;;  %851 = vmatpush2.msra.mxu0 %v319_v50  ;;  %v998_v49 = vld [vmem:[#allocation8 + $0x160] sm:$0xff]  ;;  %v963_v50 = vld [vmem:[#allocation8 + $0x48] sm:$0xff] }
  0xf1   :  { %922 = vmatpush2.msra.mxu1 %v447_v51  ;;  %852 = vmatprep.subr.mxu0 %v316_v52  ;;  %v1013_v51 = vld [vmem:[#allocation8 + $0x1d8] sm:$0xff]  ;;  %v978_v52 = vld [vmem:[#allocation8 + $0xc0] sm:$0xff] }
  0xf2   :  { %923 = vmatprep.subr.mxu1 %v444_v53  ;;  %853 = vmatpush2.msra.mxu0 %v315_v54  ;;  %v997_v53 = vld [vmem:[#allocation8 + $0x158] sm:$0xff]  ;;  %v962_v54 = vld [vmem:[#allocation8 + $0x40] sm:$0xff] }
  0xf3   :  { %924 = vmatpush2.msra.mxu1 %v443_v55  ;;  %854 = vmatprep.subr.mxu0 %v312_v56  ;;  %v1012_v55 = vld [vmem:[#allocation8 + $0x1d0] sm:$0xff]  ;;  %v977_v56 = vld [vmem:[#allocation8 + $0xb8] sm:$0xff] }
  0xf4   :  { %925 = vmatprep.subr.mxu1 %v440_v57  ;;  %855 = vmatpush2.msra.mxu0 %v311_v58  ;;  %v996_v57 = vld [vmem:[#allocation8 + $0x150] sm:$0xff]  ;;  %v961_v58 = vld [vmem:[#allocation8 + $0x38] sm:$0xff] }
  0xf5   :  { %926 = vmatpush2.msra.mxu1 %v439_v59  ;;  %856 = vmatprep.subr.mxu0 %v308_v60  ;;  %v1011_v59 = vld [vmem:[#allocation8 + $0x1c8] sm:$0xff]  ;;  %v976_v60 = vld [vmem:[#allocation8 + $0xb0] sm:$0xff] }
  0xf6   :  { %927 = vmatprep.subr.mxu1 %v436_v61  ;;  %857 = vmatpush2.msra.mxu0 %v307_v63  ;;  %v995_v61 = vld [vmem:[#allocation8 + $0x148] sm:$0xff]  ;;  %v960_v63 = vld [vmem:[#allocation8 + $0x30] sm:$0xff] }
  0xf7   :  { %928 = vmatpush2.msra.mxu1 %v435_v0  ;;  %858 = vmatprep.subr.mxu0 %v304_v1  ;;  %v1010_v0 = vld [vmem:[#allocation8 + $0x1c0] sm:$0xff]  ;;  %v975_v1 = vld [vmem:[#allocation8 + $0xa8] sm:$0xff] }
  0xf8   :  { %929 = vmatprep.subr.mxu1 %v432_v2  ;;  %859 = vmatpush2.msra.mxu0 %v303_v4  ;;  %v994_v2 = vld [vmem:[#allocation8 + $0x140] sm:$0xff]  ;;  %v959_v4 = vld [vmem:[#allocation8 + $0x28] sm:$0xff] }
  0xf9   :  { %930 = vmatpush2.msra.mxu1 %v431_v5  ;;  %860 = vmatprep.subr.mxu0 %v300_v6  ;;  %v1009_v5 = vld [vmem:[#allocation8 + $0x1b8] sm:$0xff]  ;;  %v974_v6 = vld [vmem:[#allocation8 + $0xa0] sm:$0xff] }
  0xfa   :  { %931 = vmatprep.subr.mxu1 %v428_v7  ;;  %861 = vmatpush2.msra.mxu0 %v299_v9  ;;  %v993_v7 = vld [vmem:[#allocation8 + $0x138] sm:$0xff]  ;;  %v958_v9 = vld [vmem:[#allocation8 + $0x20] sm:$0xff] }
  0xfb   :  { %932 = vmatpush2.msra.mxu1 %v427_v10  ;;  %862 = vmatprep.subr.mxu0 %v296_v12  ;;  %v1008_v10 = vld [vmem:[#allocation8 + $0x1b0] sm:$0xff]  ;;  %v973_v12 = vld [vmem:[#allocation8 + $0x98] sm:$0xff] }
  0xfc   :  { %933 = vmatprep.subr.mxu1 %v424_v13  ;;  %863 = vmatpush2.msra.mxu0 %v295_v15  ;;  %v992_v13 = vld [vmem:[#allocation8 + $0x130] sm:$0xff]  ;;  %v957_v15 = vld [vmem:[#allocation8 + $0x18] sm:$0xff] }
  0xfd   :  { %934 = vmatpush2.msra.mxu1 %v423_v16  ;;  %864 = vmatprep.subr.mxu0 %v292_v17  ;;  %v1007_v16 = vld [vmem:[#allocation8 + $0x1a8] sm:$0xff]  ;;  %v972_v17 = vld [vmem:[#allocation8 + $0x90] sm:$0xff] }
  0xfe   :  { %935 = vmatprep.subr.mxu1 %v420_v18  ;;  %865 = vmatpush2.msra.mxu0 %v291_v19  ;;  %v991_v18 = vld [vmem:[#allocation8 + $0x128] sm:$0xff]  ;;  %v956_v19 = vld [vmem:[#allocation8 + $0x10] sm:$0xff] }
  0xff   :  { %936 = vmatpush2.msra.mxu1 %v419_v20  ;;  %866 = vmatprep.subr.mxu0 %v288_v22  ;;  %v971_v20 = vld [vmem:[#allocation8 + $0x88] sm:$0xff] }
 0x100   :  { %937 = vmatprep.subr.mxu1 %v416_v23  ;;  %867 = vmatpush2.msra.mxu0 %v287_v24  ;;  %v955_v22 = vld [vmem:[#allocation8 + $0x8] sm:$0xff]  ;;  %v970_v23 = vld [vmem:[#allocation8 + $0x80] sm:$0xff] }
 0x101   :  { %938 = vmatpush2.msra.mxu1 %v415_v25  ;;  %868 = vmatprep.subr.mxu0 %v284_v26  ;;  %v954_v24 = vld [vmem:[#allocation8] sm:$0xff] }
 0x102   :  { %939 = vmatprep.subr.mxu1 %v412_v27  ;;  %869 = vmatpush2.msra.mxu0 %v283_v28  ;;  %v1006_v25 = vld [vmem:[#allocation8 + $0x1a0] sm:$0xff]  ;;  %v1005_v27 = vld [vmem:[#allocation8 + $0x198] sm:$0xff] }
 0x103   :  { %940 = vmatpush2.msra.mxu1 %v411_v29  ;;  %870 = vmatprep.subr.mxu0 %v280_v30  ;;  %v990_v26 = vld [vmem:[#allocation8 + $0x120] sm:$0xff]  ;;  %v989_v28 = vld [vmem:[#allocation8 + $0x118] sm:$0xff]  ;;  %v1004_v29 = vld [vmem:[#allocation8 + $0x190] sm:$0xff] }
 0x104   :  { %941 = vmatprep.subr.mxu1 %v408_v31  ;;  %871 = vmatpush2.msra.mxu0 %v279_v32  ;;  %v988_v30 = vld [vmem:[#allocation8 + $0x110] sm:$0xff]  ;;  %v1003_v31 = vld [vmem:[#allocation8 + $0x188] sm:$0xff] }
 0x105   :  { %872 = vmatprep.mubr.f32.mxu0 %v1464_v11  ;;  %942 = vmatpush2.msra.mxu1 %v407_v33  ;;  %v1017_v11 = vld [vmem:[#allocation8 + $0x1f8] sm:$0xff]  ;;  %v987_v32 = vld [vmem:[#allocation8 + $0x108] sm:$0xff]  ;;  %v1002_v33 = vld [vmem:[#allocation8 + $0x180] sm:$0xff] }
 0x106   :  { %943 = vmatprep.mubr.f32.mxu1 %v1474_v21  ;;  %873 = vmatmul.mubr.f32.vlgmr.msra.gmra.mxu0 %v1456_v3  ;;  %v981_v21 = vld [vmem:[#allocation8 + $0xd8] sm:$0xff]  ;;  %v1000_v3 = vld [vmem:[#allocation8 + $0x170] sm:$0xff] }
 0x107   :  { %944 = vmatmul.mubr.f32.vlgmr.msra.gmra.mxu1 %v1470_v14  ;;  %1185 = vmatprep.subr.mxu0 %v985_v34  ;;  %v965_v14 = vld [vmem:[#allocation8 + $0x58] sm:$0xff]  ;;  %v986_v34 = vld [vmem:[#allocation8 + $0x100] sm:$0xff] }
 0x108   :  { %1186 = vmatpush3.msra.mxu0 %v969_v35  ;;  %1220 = vmatprep.subr.mxu1 %v1017_v11  ;;  %v473_v35 = vsub.s32 0, %v1451_v41 }
 0x109   :  { %1187 = vmatprep.subr.mxu0 %v984_v36  ;;  %1221 = vmatpush3.msra.mxu1 %v1001_v40  ;;  %v469_v36 = vld [vmem:[#allocation7] sm:$0xf] }
 0x10a   :  { %1188 = vmatpush3.msra.mxu0 %v968_v8  ;;  %1222 = vmatprep.subr.mxu1 %v1016_v42  ;;  %v477_v8 = vsub.s32 1, %v1451_v41 }
 0x10b   :  { %1189 = vmatprep.subr.mxu0 %v983_v37  ;;  %1223 = vmatpush3.msra.mxu1 %v1000_v3 }
 0x10c   :  { %1190 = vmatpush3.msra.mxu0 %v967_v38  ;;  %1224 = vmatprep.subr.mxu1 %v1015_v43  ;;  %v474_v38 = vrot.slane %v469_v36, %v473_v35 }
 0x10d   :  { %1191 = vmatprep.subr.mxu0 %v982_v62  ;;  %1225 = vmatpush3.msra.mxu1 %v999_v45  ;;  %v478_v62 = vrot.slane %v469_v36, %v477_v8 }
 0x10e   :  { %1192 = vmatpush3.msra.mxu0 %v966_v39  ;;  %1226 = vmatprep.subr.mxu1 %v1014_v47 }
 0x10f   :  { %1193 = vmatprep.subr.mxu0 %v981_v21  ;;  %1227 = vmatpush3.msra.mxu1 %v998_v49  ;;  %v481_v49 = vsub.s32 2, %v1451_v41 }
 0x110   :  { %1194 = vmatpush3.msra.mxu0 %v965_v14  ;;  %1228 = vmatprep.subr.mxu1 %v1013_v51 }
 0x111   :  { %1195 = vmatprep.subr.mxu0 %v980_v44  ;;  %1229 = vmatpush3.msra.mxu1 %v997_v53 }
 0x112   :  { %1196 = vmatpush3.msra.mxu0 %v964_v46  ;;  %1230 = vmatprep.subr.mxu1 %v1012_v55 }
 0x113   :  { %1197 = vmatprep.subr.mxu0 %v979_v48  ;;  %1231 = vmatpush3.msra.mxu1 %v996_v57 }
 0x114   :  { %1198 = vmatpush3.msra.mxu0 %v963_v50  ;;  %1232 = vmatprep.subr.mxu1 %v1011_v59  ;;  %v485_v50 = vsub.s32 3, %v1451_v41 }
 0x115   :  { %1199 = vmatprep.subr.mxu0 %v978_v52  ;;  %1233 = vmatpush3.msra.mxu1 %v995_v61  ;;  %v482_v52 = vrot.slane %v469_v36, %v481_v49 }
 0x116   :  { %1200 = vmatpush3.msra.mxu0 %v962_v54  ;;  %1234 = vmatprep.subr.mxu1 %v1010_v0  ;;  %v486_v53 = vrot.slane %v469_v36, %v485_v50 }
 0x117   :  { %1201 = vmatprep.subr.mxu0 %v977_v56  ;;  %1235 = vmatpush3.msra.mxu1 %v994_v2 }
 0x118   :  { %1202 = vmatpush3.msra.mxu0 %v961_v58  ;;  %1236 = vmatprep.subr.mxu1 %v1009_v5 }
 0x119   :  { %1203 = vmatprep.subr.mxu0 %v976_v60  ;;  %1237 = vmatpush3.msra.mxu1 %v993_v7  ;;  %v1184_v7 = vld [vmem:[#allocation10] ss:$0 sm:$0xff] }
 0x11a   :  { %1204 = vmatpush3.msra.mxu0 %v960_v63  ;;  %1238 = vmatprep.subr.mxu1 %v1008_v10 }
 0x11b   :  { %1205 = vmatprep.subr.mxu0 %v975_v1  ;;  %1239 = vmatpush3.msra.mxu1 %v992_v13 }
 0x11c   :  { %1206 = vmatpush3.msra.mxu0 %v959_v4  ;;  %1240 = vmatprep.subr.mxu1 %v1007_v16 }
 0x11d   :  { %1207 = vmatprep.subr.mxu0 %v974_v6  ;;  %1241 = vmatpush3.msra.mxu1 %v991_v18 }
 0x11e   :  { %1208 = vmatpush3.msra.mxu0 %v958_v9  ;;  %1242 = vmatprep.subr.mxu1 %v1006_v25 }
 0x11f   :  { %1209 = vmatprep.subr.mxu0 %v973_v12  ;;  %1243 = vmatpush3.msra.mxu1 %v990_v26 }
 0x120   :  { %1210 = vmatpush3.msra.mxu0 %v957_v15  ;;  %1244 = vmatprep.subr.mxu1 %v1005_v27 }
 0x121   :  { %1211 = vmatprep.subr.mxu0 %v972_v17  ;;  %1245 = vmatpush3.msra.mxu1 %v989_v28 }
 0x122   :  { %1212 = vmatpush3.msra.mxu0 %v956_v19  ;;  %1246 = vmatprep.subr.mxu1 %v1004_v29 }
 0x123   :  { %1213 = vmatprep.subr.mxu0 %v971_v20  ;;  %1247 = vmatpush3.msra.mxu1 %v988_v30 }
 0x124   :  { %1214 = vmatpush3.msra.mxu0 %v955_v22  ;;  %1248 = vmatprep.subr.mxu1 %v1003_v31 }
 0x125   :  { %1215 = vmatprep.subr.mxu0 %v970_v23  ;;  %1249 = vmatpush3.msra.mxu1 %v987_v32 }
 0x126   :  { %1216 = vmatpush3.msra.mxu0 %v954_v24  ;;  %1250 = vmatprep.subr.mxu1 %v1002_v33 }
 0x127   :  { %1251 = vmatpush3.msra.mxu1 %v986_v34 }
 0x142   :  { %v590_v37 = vpop.f32.mrf.mxu0 }
 0x143   :  { %v591_v40 = vadd.f32 %v590_v37, %v474_v38 }
 0x144   :  { %v661_v39 = vpop.f32.mrf.mxu1  ;;  %v592_v11 = vpop.f32.mrf.mxu0 }
 0x145   :  { %v593_v42 = vadd.f32 %v592_v11, %v478_v62  ;;  %v662_v3 = vadd.f32 %v661_v39, %v591_v40 }
 0x146   :  { %v663_v21 = vpop.f32.mrf.mxu1 }
 0x147   :  { %v664_v43 = vadd.f32 %v663_v21, %v593_v42 }
 0x184   :  { %v732_v14 = vpop.f32.mrf.mxu0 }
 0x185   :  { %v733_v44 = vadd.f32 %v732_v14, %v662_v3 }
 0x186   :  { %v734_v45 = vpop.f32.mrf.mxu0  ;;  %v803_v51 = vpop.f32.mrf.mxu1 }
 0x187   :  { %v735_v46 = vadd.f32 %v734_v45, %v664_v43  ;;  %v950_v48 = vmax.f32 %v733_v44, 0.0  ;;  %v804_v55 = vadd.f32 %v803_v51, %v482_v52 }
 0x188   :  { %v805_v54 = vpop.f32.mrf.mxu1 }
 0x189   :  { %v951_v47 = vmax.f32 %v735_v46, 0.0  ;;  %v806_v58 = vadd.f32 %v805_v54, %v486_v53 }
 0x18b   :  { %1089 = vmatprep.mubr.f32.mxu0 %v951_v47 }
 0x18c   :  { %1090 = vmatmul.mubr.f32.vlgmr.msra.gmra.mxu0 %v950_v48 }
 0x1c6   :  { %v874_v56 = vpop.f32.mrf.mxu0 }
 0x1c7   :  { %v945_v57 = vpop.f32.mrf.mxu1  ;;  %v875_v59 = vadd.f32 %v874_v56, %v804_v55 }
 0x1c8   :  { %v876_v60 = vpop.f32.mrf.mxu0 }
 0x1c9   :  { %v877_v61 = vadd.f32 %v876_v60, %v806_v58  ;;  %v946_v63 = vadd.f32 %v945_v57, %v875_v59  ;;  %v947_v0 = vpop.f32.mrf.mxu1 }
 0x1cb   :  { %v948_v1 = vadd.f32 %v947_v0, %v877_v61  ;;  %v952_v4 = vmax.f32 %v946_v63, 0.0 }
 0x1cd   :  { %v953_v2 = vmax.f32 %v948_v1, 0.0 }
 0x1cf   :  { %1159 = vmatprep.mubr.f32.mxu1 %v953_v2 }
 0x1d0   :  { %1160 = vmatmul.mubr.f32.vlgmr.msra.gmra.mxu1 %v952_v4 }
 0x24c   :  { %v1217_v5 = vpop.f32.mrf.mxu0 }
 0x24e   :  { %v1218_v41 = vpop.f32.mrf.mxu0 }
 0x24f   :  { %v1219_v6 = vadd.f32 %v1218_v41, %v1217_v5 }
 0x251   :  { %v1092_v12 = vadd.f32 %v1219_v6, %v1184_v7 }
 0x290   :  { %v1252_v9 = vpop.f32.mrf.mxu1 }
 0x292   :  { %v1253_v10 = vpop.f32.mrf.mxu1 }
 0x293   :  { %v1254_v13 = vadd.f32 %v1253_v10, %v1252_v9 }
 0x295   :  { %v1162_v15 = vadd.f32 %v1254_v13, %v1092_v12 }
 0x297   :  { %1165 = vst [vmem:[#allocation11] sm:$0x3] %v1162_v15 }
 0x298   :  { %1378 = shalt.err (!%p1375_p1)
}
 0x299   :  { %1175 = dma.vmem_to_hbm [thread:$0]  %s1173_s4, 32, %s1496_s5, [#allocation4]  }
 0x29a   :  { %1393 = dma.done.wait [#allocation4], 32  }
 0x29b   :  { %1394 = vsyncadd [#allocation4], 4294967264 }
 0x29c   :  { %1179 = vsyncpa [#allocation3], 1 }
 0x29d   :  { %1180 = vsyncpa [#allocation6], 1 }
 0x29e   :  { %1181 = vsyncpa [#allocation9], 1 }
 0x29f   :  { %1182 = vsyncpa [#allocation4], 1 }

</bundles_post_ra>
